<compile_context>
chip_gen: v7x
topology: tpu7x:2x2x1
jax: 0.10.0
libtpu: 0.0.40
codegen_flags: <defaults>
</compile_context>

<pallas_src>
import functools

import numpy as np

import jax
import jax.numpy as jnp
from jax import lax
from jax.experimental import pallas as pl
from jax.experimental.pallas import tpu as pltpu

BN_EPS = 1e-5            # nn.BatchNorm1d default eps
LANE = 128
SUBLANE = 8
SEG_MATMUL_MAX_D = 64    # above this the d^3 constant tables get too big


def _round_up(v, m):
    return ((v + m - 1) // m) * m


# ----------------------------------------------------------------------------
# Kernels
# ----------------------------------------------------------------------------
def _linear_gbn_prior(x_ref, p_ref, wt_ref, g_ref, b_ref, num_groups, vbs, d):
    """Shared front end: Linear -> GhostBatchNorm (batch stats) -> * prior."""
    rows = num_groups * vbs
    # ---- Linear (no bias): single MXU matmul over the whole row tile -------
    z = jnp.dot(x_ref[...], wt_ref[...], preferred_element_type=jnp.float32)
    # ---- GhostBatchNorm: per-virtual-batch batch statistics (train mode) ---
    z3 = z.reshape(num_groups, vbs, d)
    mean = jnp.mean(z3, axis=1, keepdims=True)
    var = jnp.mean(jnp.square(z3 - mean), axis=1, keepdims=True)   # biased, as BN
    z3 = (z3 - mean) * lax.rsqrt(var + BN_EPS)
    z = z3.reshape(rows, d)
    z = z * g_ref[...] + b_ref[...]            # affine
    # ---- prior multiplication ----------------------------------------------
    return z * p_ref[...]


# Sparsemax threshold:  tau = max_c (s_c - 1) / k_c  with
#   k_c = #{j : z_j >= z_c},  s_c = sum{z_j : z_j >= z_c}.
# This is exact, including under ties: tau_k is unimodal in the support size and
# tied values at the support boundary contribute 0 to the output either way, so
# max over all candidates c recovers the sort-based sparsemax threshold.


def _attentive_kernel_seg(x_ref, p_ref, wt_ref, g_ref, b_ref,
                          tj_ref, df_ref, seg_ref, o_ref, *,
                          num_groups, vbs, d):
    """Small-d path: lane-dense (rows, d*d) pairwise layout, MXU reductions."""
    z = _linear_gbn_prior(x_ref, p_ref, wt_ref, g_ref, b_ref, num_groups, vbs, d)

    # zj[r, c*d + j]   = z[r, j]                (selection matmul, exact: 0/1 weights)
    # diff[r, c*d + j] = z[r, j] - z[r, c]      (exact single subtraction per entry)
    zj = jnp.dot(z, tj_ref[...], preferred_element_type=jnp.float32)
    diff = jnp.dot(z, df_ref[...], preferred_element_type=jnp.float32)
    ge = (diff >= 0.0).astype(jnp.float32)                       # (rows, d*d), lane-dense
    # Segment (per-candidate) reductions over j, on the MXU:
    k = jnp.dot(ge, seg_ref[...], preferred_element_type=jnp.float32)        # (rows, d)
    s = jnp.dot(ge * zj, seg_ref[...], preferred_element_type=jnp.float32)   # (rows, d)
    # exact division on purpose: pl.reciprocal(approx=True) is too coarse for tau
    tau = jnp.max((s - 1.0) / k, axis=-1, keepdims=True)                     # (rows, 1)

    o_ref[...] = jnp.maximum(z - tau, 0.0).astype(o_ref.dtype)


def _attentive_kernel_bcast(x_ref, p_ref, wt_ref, g_ref, b_ref, o_ref, *,
                            num_groups, vbs, d):
    """Large-d path (d > 64): (rows, d, d) broadcast search (little lane waste)."""
    rows = num_groups * vbs
    z = _linear_gbn_prior(x_ref, p_ref, wt_ref, g_ref, b_ref, num_groups, vbs, d)

    zrow = z.reshape(rows, 1, d)                               # z[r, j] along lanes
    eye = (lax.broadcasted_iota(jnp.int32, (d, d), 0) ==
           lax.broadcasted_iota(jnp.int32, (d, d), 1))[None, :, :]
    # TODO(synk): replace the eye-mask construction of zcol with a direct
    #             lane->sublane relayout once verified to lower on all targets.
    zcol = jnp.sum(jnp.where(eye, zrow, 0.0), axis=-1, keepdims=True)   # (rows, d, 1)
    ge = zrow >= zcol                                                    # (rows, d, d)
    k = jnp.sum(ge.astype(jnp.float32), axis=-1, keepdims=True)
    s = jnp.sum(jnp.where(ge, zrow, 0.0), axis=-1, keepdims=True)
    tau = jnp.max((s - 1.0) / k, axis=1)                                 # (rows, 1)

    o_ref[...] = jnp.maximum(z - tau, 0.0).astype(o_ref.dtype)


# ----------------------------------------------------------------------------
# Wrapper-side helpers
# ----------------------------------------------------------------------------
def _segment_constants(d):
    """Constant 0/1 selection / segment matrices for the small-d sparsemax path."""
    lane = np.arange(d * d)
    j_idx = lane % d
    c_idx = lane // d
    row = np.arange(d)[:, None]
    tj = (row == j_idx[None, :]).astype(np.float32)     # (d, d*d): picks z_j
    tc = (row == c_idx[None, :]).astype(np.float32)     # (d, d*d): picks z_c
    seg = tc.T                                           # (d*d, d): sums j per candidate c
    return jnp.asarray(tj), jnp.asarray(tj - tc), jnp.asarray(seg)


@functools.lru_cache(maxsize=None)
def _vmem_budget_and_limit():
    """Generation-aware (budget_bytes, vmem_limit_bytes)."""
    cap = 0
    try:
        info = pltpu.get_tpu_info()
        cap = int(getattr(info, "vmem_capacity_bytes", 0) or 0)
    except Exception:
        cap = 0
    if cap <= 0:
        cap = 64 * 1024 * 1024                      # unknown: assume smallest (v7x)
    if cap <= 72 * 1024 * 1024:                     # v7x-class: 64 MiB physical / TC
        return 20 * 1024 * 1024, 48 * 1024 * 1024
    # v5e / v6e: 128 MiB physical -> bigger tiles, fewer grid steps
    return 48 * 1024 * 1024, 100 * 1024 * 1024


def _choose_num_groups(n_chunks, vbs, in_dims, out_dims, in_itemsize,
                       out_itemsize, budget_bytes, use_seg):
    """# of ghost-BN chunks packed into one grid step (row tile = g * vbs)."""
    d = out_dims
    in_lanes = _round_up(in_dims, LANE)
    d_lanes = _round_up(d, LANE)

    # VMEM is (8,128)-tiled: count lane/sublane-padded footprints, not logical sizes.
    if use_seg:
        # flattened (rows, d*d) temps: zj, diff, ge, ge*zj
        spx_per_row = 4 * _round_up(d * d, LANE) * 4
        fixed = 2 * (2 * _round_up(d, SUBLANE) * _round_up(d * d, LANE)     # TJ + DIFF
                     + _round_up(d * d, SUBLANE) * d_lanes) * 4             # SEG
    else:
        # (rows, d, d) pairwise temps: zrow-bcast, ge, where(ge, z), k/s
        spx_per_row = 4 * _round_up(d, SUBLANE) * d_lanes * 4
        fixed = 0
    fixed += 2 * _round_up(in_dims, SUBLANE) * d_lanes * in_itemsize         # W^T
    fixed += 4 * SUBLANE * d_lanes * 4                                       # gamma/beta

    per_row = (2 * in_lanes * in_itemsize        # x block (double buffered)
               + 2 * d_lanes * 4                 # prior block (double buffered)
               + 2 * d_lanes * out_itemsize      # out block (double buffered)
               + 4 * d_lanes * 4                 # z / BN intermediates
               + spx_per_row)

    avail = max(budget_bytes - fixed, vbs * per_row)
    max_rows = max(avail // per_row, vbs)
    target_rows = min(max_rows, 2048)            # amortize ~0.35us/step overhead

    cands = [g for g in range(1, n_chunks + 1)
             if n_chunks % g == 0 and g * vbs <= target_rows] or [1]
    # Prefer MXU-friendly row tiles (multiples of 256); otherwise the largest tile.
    pref = [g for g in cands if (g * vbs) % 256 == 0]
    return max(pref) if pref else max(cands)


@functools.partial(jax.jit,
                   static_argnames=("virtual_batch_size", "matmul_dtype", "out_dtype"))
def attentive_transformer(p, x, w, gamma, beta, *, virtual_batch_size,
                          matmul_dtype=jnp.float32, out_dtype=jnp.float32):
    """p: [B, out_dims] prior, x: [B, in_dims], w: [out_dims, in_dims] (nn.Linear weight)."""
    batch, in_dims = x.shape
    out_dims = w.shape[0]

    n_chunks = max(batch // virtual_batch_size, 1)
    if batch % n_chunks != 0:
        # TODO(synk): PyTorch GhostBatchNorm gives the last chunk fewer rows in
        # this case; ragged chunks are not supported by this kernel.
        raise NotImplementedError("batch must divide evenly into ghost-BN chunks")
    vbs = batch // n_chunks
    if n_chunks > 1 and vbs % SUBLANE != 0:
        raise ValueError("virtual batch size must be a multiple of 8 (f32 sublane)")

    use_seg = out_dims <= SEG_MATMUL_MAX_D

    # No zero padding anywhere: blocks use full array dims on the minor axes.
    x_p = x.astype(matmul_dtype)            # single direct cast (bf16 = bandwidth knob)
    wt_p = w.T.astype(matmul_dtype)         # (in_dims, out_dims)
    p_p = p.astype(jnp.float32)
    gamma_p = gamma.astype(jnp.float32).reshape(1, -1)
    beta_p = beta.astype(jnp.float32).reshape(1, -1)

    budget, vmem_limit = _vmem_budget_and_limit()
    num_groups = _choose_num_groups(n_chunks, vbs, in_dims, out_dims,
                                    jnp.dtype(matmul_dtype).itemsize,
                                    jnp.dtype(out_dtype).itemsize,
                                    budget, use_seg)
    rows_blk = num_groups * vbs
    grid = (n_chunks // num_groups,)

    in_specs = [
        pl.BlockSpec((rows_blk, in_dims), lambda i: (i, 0)),    # x tile
        pl.BlockSpec((rows_blk, out_dims), lambda i: (i, 0)),   # prior tile
        pl.BlockSpec((in_dims, out_dims), lambda i: (0, 0)),    # W^T (resident)
        pl.BlockSpec((1, out_dims), lambda i: (0, 0)),          # gamma
        pl.BlockSpec((1, out_dims), lambda i: (0, 0)),          # beta
    ]
    args = [x_p, p_p, wt_p, gamma_p, beta_p]

    if use_seg:
        tj, df, seg = _segment_constants(out_dims)
        d2 = out_dims * out_dims
        in_specs += [
            pl.BlockSpec((out_dims, d2), lambda i: (0, 0)),     # TJ  (resident)
            pl.BlockSpec((out_dims, d2), lambda i: (0, 0)),     # DIFF (resident)
            pl.BlockSpec((d2, out_dims), lambda i: (0, 0)),     # SEG (resident)
        ]
        args += [tj, df, seg]
        kernel = functools.partial(_attentive_kernel_seg, num_groups=num_groups,
                                   vbs=vbs, d=out_dims)
    else:
        kernel = functools.partial(_attentive_kernel_bcast, num_groups=num_groups,
                                   vbs=vbs, d=out_dims)

    out = pl.pallas_call(
        kernel,
        out_shape=jax.ShapeDtypeStruct((batch, out_dims), out_dtype),
        grid_spec=pltpu.PrefetchScalarGridSpec(
            num_scalar_prefetch=0,
            grid=grid,
            in_specs=in_specs,
            out_specs=pl.BlockSpec((rows_blk, out_dims), lambda i: (i, 0)),
        ),
        compiler_params=pltpu.CompilerParams(
            dimension_semantics=("parallel",),
            vmem_limit_bytes=vmem_limit,
        ),
    )(*args)
    return out


# ----------------------- pure-JAX reference (for checking) -----------------------
def _sparsemax_ref(z):
    d = z.shape[-1]
    z_sorted = -jnp.sort(-z, axis=-1)
    cumsum = jnp.cumsum(z_sorted, axis=-1)
    k = jnp.arange(1, d + 1, dtype=z.dtype)
    support = (1.0 + k * z_sorted) > cumsum
    k_max = jnp.sum(support.astype(jnp.int32), axis=-1, keepdims=True)
    s_k = jnp.take_along_axis(cumsum, k_max - 1, axis=-1)
    tau = (s_k - 1.0) / k_max.astype(z.dtype)
    return jnp.maximum(z - tau, 0.0)


def _reference(p, x, w, gamma, beta, virtual_batch_size):
    batch = x.shape[0]
    n_chunks = max(batch // virtual_batch_size, 1)
    z = x @ w.T
    chunks = jnp.split(z, n_chunks, axis=0)
    normed = []
    for c in chunks:
        mean = jnp.mean(c, axis=0, keepdims=True)
        var = jnp.mean((c - mean) ** 2, axis=0, keepdims=True)
        normed.append((c - mean) / jnp.sqrt(var + BN_EPS) * gamma + beta)
    z = jnp.concatenate(normed, axis=0)
    z = z * p
    return _sparsemax_ref(z)


if __name__ == "__main__":
    key = jax.random.PRNGKey(0)
    kx, kp, kw, kx2, kp2, kw2 = jax.random.split(key, 6)

    # ---- config A: small mask width (d=16) -> MXU segment-matmul path ------
    batch, input_dims, output_dims, vbs = 256, 32, 16, 64
    x = jax.random.normal(kx, (batch, input_dims), dtype=jnp.float32)
    p = jax.random.uniform(kp, (batch, output_dims), dtype=jnp.float32,
                           minval=0.5, maxval=1.5)
    w = jax.random.normal(kw, (output_dims, input_dims), dtype=jnp.float32) * 0.1
    gamma = jnp.ones((output_dims,), dtype=jnp.float32)
    beta = jnp.zeros((output_dims,), dtype=jnp.float32)

    out = attentive_transformer(p, x, w, gamma, beta, virtual_batch_size=vbs)
    out = jax.block_until_ready(out)
    ref = _reference(p, x, w, gamma, beta, vbs)
    assert out.shape == (batch, output_dims)
    assert jnp.allclose(out, ref, atol=1e-4, rtol=1e-4), "f32 mismatch vs reference"
    assert jnp.allclose(jnp.sum(out, axis=-1), 1.0, atol=1e-4), "rows must sum to 1"

    # heavy-ties stress test (zeroed prior columns -> many tied zeros in z)
    p_ties = p.at[:, ::2].set(0.0)
    out_t = jax.block_until_ready(
        attentive_transformer(p_ties, x, w, gamma, beta, virtual_batch_size=vbs))
    ref_t = _reference(p_ties, x, w, gamma, beta, vbs)
    assert jnp.allclose(out_t, ref_t, atol=1e-4, rtol=1e-4), "tie-case mismatch"

    # bf16 matmul operands (bandwidth knob; MXU accumulates in f32)
    out_bf16 = jax.block_until_ready(
        attentive_transformer(p, x, w, gamma, beta, virtual_batch_size=vbs,
                              matmul_dtype=jnp.bfloat16))
    ref_bf16 = _reference(p,
                          x.astype(jnp.bfloat16).astype(jnp.float32),
                          w.astype(jnp.bfloat16).astype(jnp.float32),
                          gamma, beta, vbs)
    assert jnp.allclose(out_bf16, ref_bf16, atol=2e-3, rtol=2e-3), "bf16 mismatch"
    assert jnp.allclose(jnp.sum(out_bf16, axis=-1), 1.0, atol=1e-3)

    # ---- config B: wider mask (d=72 > 64) -> broadcast fallback path -------
    batch2, in2, out2, vbs2 = 128, 24, 72, 64
    x2 = jax.random.normal(kx2, (batch2, in2), dtype=jnp.float32)
    p2 = jax.random.uniform(kp2, (batch2, out2), dtype=jnp.float32,
                            minval=0.5, maxval=1.5)
    w2 = jax.random.normal(kw2, (out2, in2), dtype=jnp.float32) * 0.1
    gamma2 = jnp.ones((out2,), dtype=jnp.float32)
    beta2 = jnp.zeros((out2,), dtype=jnp.float32)

    out2_k = jax.block_until_ready(
        attentive_transformer(p2, x2, w2, gamma2, beta2, virtual_batch_size=vbs2))
    ref2 = _reference(p2, x2, w2, gamma2, beta2, vbs2)
    assert out2_k.shape == (batch2, out2)
    assert jnp.allclose(out2_k, ref2, atol=1e-4, rtol=1e-4), "fallback-path mismatch"
    assert jnp.allclose(jnp.sum(out2_k, axis=-1), 1.0, atol=1e-4)

    print("KERNEL_OK")
</pallas_src>

<mosaic_0001>
module attributes {stable_mosaic.version = 11 : i64} {
  func.func @_attentive_kernel_seg(%arg0: i32, %arg1: memref<256x32xf32, #tpu.memory_space<vmem>>, %arg2: memref<256x16xf32, #tpu.memory_space<vmem>>, %arg3: memref<32x16xf32, #tpu.memory_space<vmem>>, %arg4: memref<1x16xf32, #tpu.memory_space<vmem>>, %arg5: memref<1x16xf32, #tpu.memory_space<vmem>>, %arg6: memref<16x256xf32, #tpu.memory_space<vmem>>, %arg7: memref<16x256xf32, #tpu.memory_space<vmem>>, %arg8: memref<256x16xf32, #tpu.memory_space<vmem>>, %arg9: memref<256x16xf32, #tpu.memory_space<vmem>>) attributes {dimension_semantics = [#tpu.dimension_semantics<parallel>], iteration_bounds = array<i64: 1>, scalar_prefetch = 0 : i64, scratch_operands = 0 : i64, tpu.core_type = #tpu.core_type<tc>, window_params = [{transform_indices = @transform_0, window_bounds = array<i64: 256, 32>}, {transform_indices = @transform_1, window_bounds = array<i64: 256, 16>}, {pipeline_mode = #tpu.pipeline_mode<synchronous>, transform_indices = @transform_2, window_bounds = array<i64: 32, 16>}, {pipeline_mode = #tpu.pipeline_mode<synchronous>, transform_indices = @transform_3, window_bounds = array<i64: 1, 16>}, {pipeline_mode = #tpu.pipeline_mode<synchronous>, transform_indices = @transform_4, window_bounds = array<i64: 1, 16>}, {pipeline_mode = #tpu.pipeline_mode<synchronous>, transform_indices = @transform_5, window_bounds = array<i64: 16, 256>}, {pipeline_mode = #tpu.pipeline_mode<synchronous>, transform_indices = @transform_6, window_bounds = array<i64: 16, 256>}, {pipeline_mode = #tpu.pipeline_mode<synchronous>, transform_indices = @transform_7, window_bounds = array<i64: 256, 16>}, {transform_indices = @transform_8, window_bounds = array<i64: 256, 16>}]} {
    %c0 = arith.constant 0 : index
    %c0_0 = arith.constant 0 : index
    %0 = vector.load %arg1[%c0, %c0_0] : memref<256x32xf32, #tpu.memory_space<vmem>>, vector<256x32xf32>
    %c0_1 = arith.constant 0 : index
    %c0_2 = arith.constant 0 : index
    %1 = vector.load %arg3[%c0_1, %c0_2] : memref<32x16xf32, #tpu.memory_space<vmem>>, vector<32x16xf32>
    %cst = arith.constant dense<0.000000e+00> : vector<256x16xf32>
    %2 = tpu.matmul %0, %1, %cst {dimension_numbers = #tpu.dot_dimension_numbers<[1], [0], [0], [1], [0, 0, 1, 1], [], []>} : vector<256x32xf32>, vector<32x16xf32>, vector<256x16xf32> -> vector<256x16xf32>
    %3 = vector.shape_cast %2 : vector<256x16xf32> to vector<4x64x16xf32>
    %cst_3 = arith.constant dense<0.000000e+00> : vector<4x16xf32>
    %4 = vector.multi_reduction <add>, %3, %cst_3 [1] : vector<4x64x16xf32> to vector<4x16xf32>
    %5 = vector.shape_cast %4 : vector<4x16xf32> to vector<4x1x16xf32>
    %cst_4 = arith.constant 6.400000e+01 : f32
    %6 = vector.broadcast %cst_4 : f32 to vector<4x1x16xf32>
    %7 = arith.divf %5, %6 : vector<4x1x16xf32>
    %8 = vector.broadcast %7 : vector<4x1x16xf32> to vector<4x64x16xf32>
    %9 = arith.subf %3, %8 : vector<4x64x16xf32>
    %10 = arith.mulf %9, %9 : vector<4x64x16xf32>
    %cst_5 = arith.constant dense<0.000000e+00> : vector<4x16xf32>
    %11 = vector.multi_reduction <add>, %10, %cst_5 [1] : vector<4x64x16xf32> to vector<4x16xf32>
    %12 = vector.shape_cast %11 : vector<4x16xf32> to vector<4x1x16xf32>
    %cst_6 = arith.constant 6.400000e+01 : f32
    %13 = vector.broadcast %cst_6 : f32 to vector<4x1x16xf32>
    %14 = arith.divf %12, %13 : vector<4x1x16xf32>
    %15 = vector.broadcast %7 : vector<4x1x16xf32> to vector<4x64x16xf32>
    %16 = arith.subf %3, %15 : vector<4x64x16xf32>
    %cst_7 = arith.constant 9.99999974E-6 : f32
    %17 = vector.broadcast %cst_7 : f32 to vector<4x1x16xf32>
    %18 = arith.addf %14, %17 : vector<4x1x16xf32>
    %19 = math.rsqrt %18 : vector<4x1x16xf32>
    %20 = vector.broadcast %19 : vector<4x1x16xf32> to vector<4x64x16xf32>
    %21 = arith.mulf %16, %20 : vector<4x64x16xf32>
    %22 = vector.shape_cast %21 : vector<4x64x16xf32> to vector<256x16xf32>
    %c0_8 = arith.constant 0 : index
    %c0_9 = arith.constant 0 : index
    %23 = vector.load %arg4[%c0_8, %c0_9] : memref<1x16xf32, #tpu.memory_space<vmem>>, vector<1x16xf32>
    %24 = vector.broadcast %23 : vector<1x16xf32> to vector<256x16xf32>
    %25 = arith.mulf %22, %24 : vector<256x16xf32>
    %c0_10 = arith.constant 0 : index
    %c0_11 = arith.constant 0 : index
    %26 = vector.load %arg5[%c0_10, %c0_11] : memref<1x16xf32, #tpu.memory_space<vmem>>, vector<1x16xf32>
    %27 = vector.broadcast %26 : vector<1x16xf32> to vector<256x16xf32>
    %28 = arith.addf %25, %27 : vector<256x16xf32>
    %c0_12 = arith.constant 0 : index
    %c0_13 = arith.constant 0 : index
    %29 = vector.load %arg2[%c0_12, %c0_13] : memref<256x16xf32, #tpu.memory_space<vmem>>, vector<256x16xf32>
    %30 = arith.mulf %28, %29 : vector<256x16xf32>
    %c0_14 = arith.constant 0 : index
    %c0_15 = arith.constant 0 : index
    %31 = vector.load %arg6[%c0_14, %c0_15] : memref<16x256xf32, #tpu.memory_space<vmem>>, vector<16x256xf32>
    %cst_16 = arith.constant dense<0.000000e+00> : vector<256x256xf32>
    %32 = tpu.matmul %30, %31, %cst_16 {dimension_numbers = #tpu.dot_dimension_numbers<[1], [0], [0], [1], [0, 0, 1, 1], [], []>} : vector<256x16xf32>, vector<16x256xf32>, vector<256x256xf32> -> vector<256x256xf32>
    %c0_17 = arith.constant 0 : index
    %c0_18 = arith.constant 0 : index
    %33 = vector.load %arg7[%c0_17, %c0_18] : memref<16x256xf32, #tpu.memory_space<vmem>>, vector<16x256xf32>
    %cst_19 = arith.constant dense<0.000000e+00> : vector<256x256xf32>
    %34 = tpu.matmul %30, %33, %cst_19 {dimension_numbers = #tpu.dot_dimension_numbers<[1], [0], [0], [1], [0, 0, 1, 1], [], []>} : vector<256x16xf32>, vector<16x256xf32>, vector<256x256xf32> -> vector<256x256xf32>
    %cst_20 = arith.constant 0.000000e+00 : f32
    %35 = vector.broadcast %cst_20 : f32 to vector<256x256xf32>
    %36 = arith.cmpf oge, %34, %35 : vector<256x256xf32>
    %37 = arith.extui %36 : vector<256x256xi1> to vector<256x256xi32>
    %38 = arith.sitofp %37 : vector<256x256xi32> to vector<256x256xf32>
    %c0_21 = arith.constant 0 : index
    %c0_22 = arith.constant 0 : index
    %39 = vector.load %arg8[%c0_21, %c0_22] : memref<256x16xf32, #tpu.memory_space<vmem>>, vector<256x16xf32>
    %cst_23 = arith.constant dense<0.000000e+00> : vector<256x16xf32>
    %40 = tpu.matmul %38, %39, %cst_23 {dimension_numbers = #tpu.dot_dimension_numbers<[1], [0], [0], [1], [0, 0, 1, 1], [], []>} : vector<256x256xf32>, vector<256x16xf32>, vector<256x16xf32> -> vector<256x16xf32>
    %41 = arith.mulf %38, %32 : vector<256x256xf32>
    %c0_24 = arith.constant 0 : index
    %c0_25 = arith.constant 0 : index
    %42 = vector.load %arg8[%c0_24, %c0_25] : memref<256x16xf32, #tpu.memory_space<vmem>>, vector<256x16xf32>
    %cst_26 = arith.constant dense<0.000000e+00> : vector<256x16xf32>
    %43 = tpu.matmul %41, %42, %cst_26 {dimension_numbers = #tpu.dot_dimension_numbers<[1], [0], [0], [1], [0, 0, 1, 1], [], []>} : vector<256x256xf32>, vector<256x16xf32>, vector<256x16xf32> -> vector<256x16xf32>
    %cst_27 = arith.constant 1.000000e+00 : f32
    %44 = vector.broadcast %cst_27 : f32 to vector<256x16xf32>
    %45 = arith.subf %43, %44 : vector<256x16xf32>
    %46 = arith.divf %45, %40 : vector<256x16xf32>
    %cst_28 = arith.constant dense<0xFF800000> : vector<256xf32>
    %47 = vector.multi_reduction <maximumf>, %46, %cst_28 [1] : vector<256x16xf32> to vector<256xf32>
    %48 = vector.shape_cast %47 : vector<256xf32> to vector<256x1xf32>
    %49 = vector.broadcast %48 : vector<256x1xf32> to vector<256x16xf32>
    %50 = arith.subf %30, %49 : vector<256x16xf32>
    %cst_29 = arith.constant 0.000000e+00 : f32
    %51 = vector.broadcast %cst_29 : f32 to vector<256x16xf32>
    %52 = arith.maximumf %50, %51 : vector<256x16xf32>
    %c0_30 = arith.constant 0 : index
    %c0_31 = arith.constant 0 : index
    %53 = vector.load %arg9[%c0_30, %c0_31] : memref<256x16xf32, #tpu.memory_space<vmem>>, vector<256x16xf32>
    tpu.vector_store %arg9[%c0_30, %c0_31], %52 {strides = array<i32>} : memref<256x16xf32, #tpu.memory_space<vmem>>, vector<256x16xf32>,
    return
  }
  func.func @transform_0(%arg0: i32) -> (i32, i32) {
    %c0_i32 = arith.constant 0 : i32
    %c0_i32_0 = arith.constant 0 : i32
    return %arg0, %c0_i32 : i32, i32
  }
  func.func @transform_1(%arg0: i32) -> (i32, i32) {
    %c0_i32 = arith.constant 0 : i32
    %c0_i32_0 = arith.constant 0 : i32
    return %arg0, %c0_i32 : i32, i32
  }
  func.func @transform_2(%arg0: i32) -> (i32, i32) {
    %c0_i32 = arith.constant 0 : i32
    %c0_i32_0 = arith.constant 0 : i32
    %c0_i32_1 = arith.constant 0 : i32
    return %c0_i32, %c0_i32_0 : i32, i32
  }
  func.func @transform_3(%arg0: i32) -> (i32, i32) {
    %c0_i32 = arith.constant 0 : i32
    %c0_i32_0 = arith.constant 0 : i32
    %c0_i32_1 = arith.constant 0 : i32
    return %c0_i32, %c0_i32_0 : i32, i32
  }
  func.func @transform_4(%arg0: i32) -> (i32, i32) {
    %c0_i32 = arith.constant 0 : i32
    %c0_i32_0 = arith.constant 0 : i32
    %c0_i32_1 = arith.constant 0 : i32
    return %c0_i32, %c0_i32_0 : i32, i32
  }
  func.func @transform_5(%arg0: i32) -> (i32, i32) {
    %c0_i32 = arith.constant 0 : i32
    %c0_i32_0 = arith.constant 0 : i32
    %c0_i32_1 = arith.constant 0 : i32
    return %c0_i32, %c0_i32_0 : i32, i32
  }
  func.func @transform_6(%arg0: i32) -> (i32, i32) {
    %c0_i32 = arith.constant 0 : i32
    %c0_i32_0 = arith.constant 0 : i32
    %c0_i32_1 = arith.constant 0 : i32
    return %c0_i32, %c0_i32_0 : i32, i32
  }
  func.func @transform_7(%arg0: i32) -> (i32, i32) {
    %c0_i32 = arith.constant 0 : i32
    %c0_i32_0 = arith.constant 0 : i32
    %c0_i32_1 = arith.constant 0 : i32
    return %c0_i32, %c0_i32_0 : i32, i32
  }
  func.func @transform_8(%arg0: i32) -> (i32, i32) {
    %c0_i32 = arith.constant 0 : i32
    %c0_i32_0 = arith.constant 0 : i32
    return %arg0, %c0_i32 : i32, i32
  }
}

</mosaic_0001>

<bundles_post_ra>
// kernel: attentive_transformer.1
= control target key start
LH: loop header
LB: loop body
LE: loop exit
PB: predicated region body
PF: predicated region fallthrough
CT: control target
= control target key end

     0   :  { %vm65_vm0 = vcmask 261120   ;;  %v3000_v50 = vmov 0.0   ;;  %vm387_vm1 = vcmask 130048   ;;  %s4511_s2 = inlined_call_operand.vmem [shape: f32[32,16], index: 2, kind: input, shape index: {}]   ;;  %s4512_s0 = inlined_call_operand.vmem [shape: f32[256,32], index: 0, kind: input, shape index: {}]   ;;  %s4513_s6 = inlined_call_operand.vmem [shape: f32[16,256], index: 6, kind: input, shape index: {}]   ;;  %s4514_s5 = inlined_call_operand.vmem [shape: f32[16,256], index: 5, kind: input, shape index: {}]   ;;  %s4515_s3 = inlined_call_operand.vmem [shape: f32[1,16], index: 3, kind: input, shape index: {}]   ;;  %s4516_s7 = inlined_call_operand.vmem [shape: f32[256,16], index: 7, kind: input, shape index: {}]   ;;  %s4517_s4 = inlined_call_operand.vmem [shape: f32[1,16], index: 4, kind: input, shape index: {}]   ;;  %s4518_s1 = inlined_call_operand.vmem [shape: f32[256,16], index: 1, kind: input, shape index: {}]   ;;  %s4519_s8 = inlined_call_operand.vmem [shape: f32[256,16], index: 8, kind: output, shape index: {}]  }
   0x1   :  { %v61_v0 = vld [vmem:[%s4511_s2] sm:$0xff]  ;;  %v62_v1 = vld [vmem:[%s4511_s2 + $0x8] sm:$0xff]  ;;  %v63_v2 = vld [vmem:[%s4511_s2 + $0x10] sm:$0xff] }
   0x2   :  { %v2809_v3 = vpack.c.bf16 %v62_v1, %v61_v0  ;;  %v64_v4 = vld [vmem:[%s4511_s2 + $0x18] sm:$0xff]  ;;  %v29_v5 = vld [vmem:[%s4512_s0] sm:$0xff]  ;;  %v30_v8 = vld [vmem:[%s4512_s0 + $0x8] sm:$0xff] }
   0x3   :  { %v45_v6 = vld [vmem:[%s4512_s0 + $0x80] sm:$0xff]  ;;  %v2813_v7 = vpack.c.bf16 %v64_v4, %v63_v2  ;;  %2761 = vmatprep.mubr.msk.f32.mxu0 %vm65_vm0, %v29_v5  ;;  %v46_v9 = vld [vmem:[%s4512_s0 + $0x88] sm:$0xff]  ;;  %v31_v10 = vld [vmem:[%s4512_s0 + $0x10] sm:$0xff] }
   0x4   :  { %2785 = vmatprep.mubr.msk.f32.mxu1 %vm65_vm0, %v45_v6  ;;  %2810 = vmatprep.subr.bf16.mxu0 %v2809_v3  ;;  %v47_v11 = vld [vmem:[%s4512_s0 + $0x90] sm:$0xff]  ;;  %v32_v12 = vld [vmem:[%s4512_s0 + $0x18] sm:$0xff]  ;;  %v33_v14 = vld [vmem:[%s4512_s0 + $0x20] sm:$0xff] }
   0x5   :  { %2921 = vmatprep.subr.bf16.mxu1 %v2809_v3  ;;  %2812 = vmatpush3.bf16.msra.mxu0 %v2809_v3  ;;  %v48_v13 = vld [vmem:[%s4512_s0 + $0x98] sm:$0xff]  ;;  %v49_v15 = vld [vmem:[%s4512_s0 + $0xa0] sm:$0xff]  ;;  %v34_v16 = vld [vmem:[%s4512_s0 + $0x28] sm:$0xff] }
   0x6   :  { %2923 = vmatpush3.bf16.msra.mxu1 %v2809_v3  ;;  %2814 = vmatprep.subr.bf16.mxu0 %v2813_v7  ;;  %v50_v17 = vld [vmem:[%s4512_s0 + $0xa8] sm:$0xff]  ;;  %v35_v18 = vld [vmem:[%s4512_s0 + $0x30] sm:$0xff]  ;;  %v36_v20 = vld [vmem:[%s4512_s0 + $0x38] sm:$0xff] }
   0x7   :  { %2922 = vmatprep.subr.bf16.mxu1 %v2813_v7  ;;  %v51_v19 = vld [vmem:[%s4512_s0 + $0xb0] sm:$0xff]  ;;  %v52_v21 = vld [vmem:[%s4512_s0 + $0xb8] sm:$0xff]  ;;  %v37_v22 = vld [vmem:[%s4512_s0 + $0x40] sm:$0xff] }
   0x8   :  { %v53_v23 = vld [vmem:[%s4512_s0 + $0xc0] sm:$0xff]  ;;  %v38_v24 = vld [vmem:[%s4512_s0 + $0x48] sm:$0xff]  ;;  %v39_v26 = vld [vmem:[%s4512_s0 + $0x50] sm:$0xff] }
   0x9   :  { %2816 = vmatpush3.bf16.msra.mxu0 %v2813_v7  ;;  %v54_v25 = vld [vmem:[%s4512_s0 + $0xc8] sm:$0xff]  ;;  %v55_v27 = vld [vmem:[%s4512_s0 + $0xd0] sm:$0xff]  ;;  %v40_v28 = vld [vmem:[%s4512_s0 + $0x58] sm:$0xff] }
   0xa   :  { %2924 = vmatpush3.bf16.msra.mxu1 %v2813_v7  ;;  %v56_v29 = vld [vmem:[%s4512_s0 + $0xd8] sm:$0xff]  ;;  %v41_v30 = vld [vmem:[%s4512_s0 + $0x60] sm:$0xff]  ;;  %v42_v32 = vld [vmem:[%s4512_s0 + $0x68] sm:$0xff] }
   0xb   :  { %v57_v31 = vld [vmem:[%s4512_s0 + $0xe0] sm:$0xff]  ;;  %v58_v33 = vld [vmem:[%s4512_s0 + $0xe8] sm:$0xff]  ;;  %v43_v34 = vld [vmem:[%s4512_s0 + $0x70] sm:$0xff] }
   0xc   :  { %2762 = vmatmul.mubr.msk.f32.vlgmr.msra.gmra.mrb[0].mxu0 %vm65_vm0, %v30_v8  ;;  %v59_v35 = vld [vmem:[%s4512_s0 + $0xf0] sm:$0xff]  ;;  %v44_v36 = vld [vmem:[%s4512_s0 + $0x78] sm:$0xff]  ;;  %v1169_v38 = vld [vmem:[%s4513_s6 + $0x8] sm:$0xff] }
   0xd   :  { %2786 = vmatmul.mubr.msk.f32.vlgmr.msra.gmra.mrb[0].mxu1 %vm65_vm0, %v46_v9  ;;  %2764 = vmatprep.mubr.msk.f32.mxu0 %vm65_vm0, %v31_v10  ;;  %v60_v37 = vld [vmem:[%s4512_s0 + $0xf8] sm:$0xff]  ;;  %v812_v40 = vld [vmem:[%s4514_s5 + $0x8] sm:$0xff]  ;;  %v1168_v42 = vld [vmem:[%s4513_s6] sm:$0xff] }
   0xe   :  { %2788 = vmatprep.mubr.msk.f32.mxu1 %vm65_vm0, %v47_v11  ;;  %v1171_v39 = vld [vmem:[%s4513_s6 + $0x18] sm:$0xff]  ;;  %v1170_v43 = vld [vmem:[%s4513_s6 + $0x10] sm:$0xff]  ;;  %v811_v47 = vld [vmem:[%s4514_s5] sm:$0xff] }
   0xf   :  { %v2821_v41 = vpack.c.bf16 %v1171_v39, %v1169_v38  ;;  %v814_v44 = vld [vmem:[%s4514_s5 + $0x18] sm:$0xff]  ;;  %v2823_v45 = vpack.c.bf16 %v1170_v43, %v1168_v42  ;;  %v813_v48 = vld [vmem:[%s4514_s5 + $0x10] sm:$0xff] }
  0x10   :  { %2765 = vmatmul.mubr.msk.f32.gmra.mrb[2].mxu0 %vm65_vm0, %v32_v12  ;;  %v2817_v46 = vpack.c.bf16 %v814_v44, %v812_v40  ;;  %v2819_v49 = vpack.c.bf16 %v813_v48, %v811_v47 }
  0x11   :  { %2789 = vmatmul.mubr.msk.f32.gmra.mrb[2].mxu1 %vm65_vm0, %v48_v13  ;;  %2767 = vmatprep.mubr.msk.f32.mxu0 %vm65_vm0, %v33_v14 }
  0x12   :  { %2791 = vmatprep.mubr.msk.f32.mxu1 %vm65_vm0, %v49_v15  ;;  %2822 = vmatprep.subr.bf16.mxu0 %v2821_v41 }
  0x13   :  { %2824 = vmatpush1.bf16.msra.mxu0 %v2823_v45  ;;  %2818 = vmatprep.subr.bf16.mxu1 %v2817_v46 }
  0x14   :  { %2768 = vmatmul.mubr.msk.f32.gmra.mrb[4].mxu0 %vm65_vm0, %v34_v16  ;;  %2820 = vmatpush1.bf16.msra.mxu1 %v2819_v49 }
  0x15   :  { %2792 = vmatmul.mubr.msk.f32.gmra.mrb[4].mxu1 %vm65_vm0, %v50_v17  ;;  %2770 = vmatprep.mubr.msk.f32.mxu0 %vm65_vm0, %v35_v18 }
  0x16   :  { %2794 = vmatprep.mubr.msk.f32.mxu1 %vm65_vm0, %v51_v19 }
  0x18   :  { %2771 = vmatmul.mubr.msk.f32.gmra.mrb[6].mxu0 %vm65_vm0, %v36_v20 }
  0x19   :  { %2795 = vmatmul.mubr.msk.f32.gmra.mrb[6].mxu1 %vm65_vm0, %v52_v21  ;;  %2773 = vmatprep.mubr.msk.f32.mxu0 %vm65_vm0, %v37_v22 }
  0x1a   :  { %2797 = vmatprep.mubr.msk.f32.mxu1 %vm65_vm0, %v53_v23 }
  0x1c   :  { %2774 = vmatmul.mubr.msk.f32.gmra.mrb[8].mxu0 %vm65_vm0, %v38_v24 }
  0x1d   :  { %2798 = vmatmul.mubr.msk.f32.gmra.mrb[8].mxu1 %vm65_vm0, %v54_v25  ;;  %2776 = vmatprep.mubr.msk.f32.mxu0 %vm65_vm0, %v39_v26 }
  0x1e   :  { %2800 = vmatprep.mubr.msk.f32.mxu1 %vm65_vm0, %v55_v27 }
  0x20   :  { %2777 = vmatmul.mubr.msk.f32.gmra.mrb[10].mxu0 %vm65_vm0, %v40_v28 }
  0x21   :  { %2801 = vmatmul.mubr.msk.f32.gmra.mrb[10].mxu1 %vm65_vm0, %v56_v29  ;;  %2779 = vmatprep.mubr.msk.f32.mxu0 %vm65_vm0, %v41_v30 }
  0x22   :  { %2803 = vmatprep.mubr.msk.f32.mxu1 %vm65_vm0, %v57_v31 }
  0x24   :  { %2780 = vmatmul.mubr.msk.f32.gmra.mrb[12].mxu0 %vm65_vm0, %v42_v32 }
  0x25   :  { %2804 = vmatmul.mubr.msk.f32.gmra.mrb[12].mxu1 %vm65_vm0, %v58_v33  ;;  %2782 = vmatprep.mubr.msk.f32.mxu0 %vm65_vm0, %v43_v34 }
  0x26   :  { %2806 = vmatprep.mubr.msk.f32.mxu1 %vm65_vm0, %v59_v35 }
  0x28   :  { %2783 = vmatmul.mubr.msk.f32.gmra.mrb[14].mxu0 %vm65_vm0, %v44_v36 }
  0x29   :  { %2807 = vmatmul.mubr.msk.f32.gmra.mrb[14].mxu1 %vm65_vm0, %v60_v37  ;;  %1236 = vmatprep.mubr.f32.mxu0 %v3000_v50 }
  0x2a   :  { %975 = vmatprep.mubr.f32.mxu1 %v3000_v50 }
  0xdf   :  { %v3214_v51 = vpop.f32.mrb[0].mxu0 }
  0xe0   :  { %v3216_v52 = vpop.f32.mrb[0].mxu1  ;;  %v389_v53 = vsel %vm387_vm1, %v3214_v51, 0.0  ;;  %v3220_v54 = vpop.f32.mrb[1].mxu0 }
  0xe1   :  { %v431_v55 = vsel %vm387_vm1, %v3216_v52, 0.0  ;;  %v3224_v56 = vpop.f32.mrb[1].mxu1  ;;  %v388_v57 = vsel %vm387_vm1, %v3220_v54, 0.0 }
  0xe2   :  { %v430_v58 = vsel %vm387_vm1, %v3224_v56, 0.0  ;;  %v390_v59 = vadd.f32 %v389_v53, %v388_v57 }
  0xe3   :  { %v432_v60 = vadd.f32 %v431_v55, %v430_v58  ;;  %v3230_v61 = vpop.f32.mrb[2].mxu0 }
  0xe4   :  { %v3232_v62 = vpop.f32.mrb[2].mxu1  ;;  %v3234_v63 = vpop.f32.mrb[3].mxu0  ;;  %v393_v6 = vsel %vm387_vm1, %v3230_v61, 0.0 }
  0xe5   :  { %v3236_v0 = vpop.f32.mrb[3].mxu1  ;;  %v435_v1 = vsel %vm387_vm1, %v3232_v62, 0.0  ;;  %v391_v2 = vsel %vm387_vm1, %v3234_v63, 0.0 }
  0xe6   :  { %v433_v3 = vsel %vm387_vm1, %v3236_v0, 0.0  ;;  %v392_v4 = vadd.f32 %v391_v2, %v390_v59 }
  0xe7   :  { %v434_v5 = vadd.f32 %v433_v3, %v432_v60  ;;  %v3246_v7 = vpop.f32.mrb[4].mxu0 }
  0xe8   :  { %v3248_v8 = vpop.f32.mrb[4].mxu1  ;;  %v3250_v9 = vpop.f32.mrb[5].mxu0  ;;  %v394_v10 = vadd.f32 %v393_v6, %v392_v4  ;;  %v397_v18 = vsel %vm387_vm1, %v3246_v7, 0.0 }
  0xe9   :  { %v3252_v11 = vpop.f32.mrb[5].mxu1  ;;  %v436_v12 = vadd.f32 %v435_v1, %v434_v5  ;;  %v439_v13 = vsel %vm387_vm1, %v3248_v8, 0.0  ;;  %v395_v14 = vsel %vm387_vm1, %v3250_v9, 0.0 }
  0xea   :  { %v437_v15 = vsel %vm387_vm1, %v3252_v11, 0.0  ;;  %v396_v16 = vadd.f32 %v395_v14, %v394_v10 }
  0xeb   :  { %v438_v17 = vadd.f32 %v437_v15, %v436_v12  ;;  %v3262_v19 = vpop.f32.mrb[6].mxu0 }
  0xec   :  { %v3264_v20 = vpop.f32.mrb[6].mxu1  ;;  %v3266_v21 = vpop.f32.mrb[7].mxu0  ;;  %v398_v22 = vadd.f32 %v397_v18, %v396_v16  ;;  %v401_v30 = vsel %vm387_vm1, %v3262_v19, 0.0 }
  0xed   :  { %v3268_v23 = vpop.f32.mrb[7].mxu1  ;;  %v440_v24 = vadd.f32 %v439_v13, %v438_v17  ;;  %v443_v25 = vsel %vm387_vm1, %v3264_v20, 0.0  ;;  %v399_v26 = vsel %vm387_vm1, %v3266_v21, 0.0 }
  0xee   :  { %v441_v27 = vsel %vm387_vm1, %v3268_v23, 0.0  ;;  %v400_v28 = vadd.f32 %v399_v26, %v398_v22 }
  0xef   :  { %v442_v29 = vadd.f32 %v441_v27, %v440_v24  ;;  %v3278_v31 = vpop.f32.mrb[8].mxu0 }
  0xf0   :  { %v3280_v32 = vpop.f32.mrb[8].mxu1  ;;  %v402_v33 = vadd.f32 %v401_v30, %v400_v28  ;;  %v410_v35 = vsel %vm387_vm1, %v3278_v31, 0.0  ;;  %v3284_v36 = vpop.f32.mrb[9].mxu0 }
  0xf1   :  { %v444_v34 = vadd.f32 %v443_v25, %v442_v29  ;;  %v452_v37 = vsel %vm387_vm1, %v3280_v32, 0.0  ;;  %v3288_v38 = vpop.f32.mrb[9].mxu1  ;;  %v409_v39 = vsel %vm387_vm1, %v3284_v36, 0.0 }
  0xf2   :  { %v451_v40 = vsel %vm387_vm1, %v3288_v38, 0.0  ;;  %v403_v41 = vrot.slane %v402_v33, 4  ;;  %v411_v43 = vadd.f32 %v410_v35, %v409_v39 }
  0xf3   :  { %v445_v42 = vrot.slane %v444_v34, 4  ;;  %v453_v44 = vadd.f32 %v452_v37, %v451_v40  ;;  %v3294_v45 = vpop.f32.mrb[10].mxu0 }
  0xf4   :  { %v3296_v46 = vpop.f32.mrb[10].mxu1  ;;  %v404_v47 = vadd.f32 %v403_v41, %v402_v33  ;;  %v3298_v49 = vpop.f32.mrb[11].mxu0  ;;  %v414_v55 = vsel %vm387_vm1, %v3294_v45, 0.0 }
  0xf5   :  { %v446_v48 = vadd.f32 %v445_v42, %v444_v34  ;;  %v3300_v53 = vpop.f32.mrb[11].mxu1  ;;  %v412_v57 = vsel %vm387_vm1, %v3298_v49, 0.0  ;;  %v456_v58 = vsel %vm387_vm1, %v3296_v46, 0.0 }
  0xf6   :  { %v454_v59 = vsel %vm387_vm1, %v3300_v53, 0.0  ;;  %v405_v60 = vrot.slane %v404_v47, 2  ;;  %v413_v2 = vadd.f32 %v412_v57, %v411_v43 }
  0xf7   :  { %v447_v1 = vrot.slane %v446_v48, 2  ;;  %v455_v3 = vadd.f32 %v454_v59, %v453_v44  ;;  %v3310_v4 = vpop.f32.mrb[12].mxu0 }
  0xf8   :  { %v3312_v5 = vpop.f32.mrb[12].mxu1  ;;  %v406_v6 = vadd.f32 %v405_v60, %v404_v47  ;;  %v3314_v12 = vpop.f32.mrb[13].mxu0  ;;  %v415_v13 = vadd.f32 %v414_v55, %v413_v2  ;;  %v418_v15 = vsel %vm387_vm1, %v3310_v4, 0.0 }
  0xf9   :  { %v448_v10 = vadd.f32 %v447_v1, %v446_v48  ;;  %v3316_v14 = vpop.f32.mrb[13].mxu1  ;;  %v416_v16 = vsel %vm387_vm1, %v3314_v12, 0.0  ;;  %v457_v17 = vadd.f32 %v456_v58, %v455_v3  ;;  %v460_v26 = vsel %vm387_vm1, %v3312_v5, 0.0 }
  0xfa   :  { %v458_v18 = vsel %vm387_vm1, %v3316_v14, 0.0  ;;  %v407_v22 = vrot.slane %v406_v6, 1  ;;  %v417_v25 = vadd.f32 %v416_v16, %v415_v13 }
  0xfb   :  { %v449_v24 = vrot.slane %v448_v10, 1  ;;  %v3326_v27 = vpop.f32.mrb[14].mxu0  ;;  %v459_v28 = vadd.f32 %v458_v18, %v457_v17 }
  0xfc   :  { %v3328_v29 = vpop.f32.mrb[14].mxu1  ;;  %v408_v30 = vadd.f32 %v407_v22, %v406_v6  ;;  %v3330_v34 = vpop.f32.mrb[15].mxu0  ;;  %v419_v35 = vadd.f32 %v418_v15, %v417_v25 }
  0xfd   :  { %v450_v33 = vadd.f32 %v449_v24, %v448_v10  ;;  %v3332_v37 = vpop.f32.mrb[15].mxu1  ;;  %v420_v39 = vsel %vm387_vm1, %v3330_v34, 0.0  ;;  %v461_v40 = vadd.f32 %v460_v26, %v459_v28 }
  0xfe   :  { %v462_v41 = vsel %vm387_vm1, %v3332_v37, 0.0  ;;  %v473_v42 = vmul.f32 0.015625, %v408_v30  ;;  %v421_v43 = vadd.f32 %v420_v39, %v419_v35  ;;  %v464_v30 = vsel %vm387_vm1, %v3328_v29, 0.0 }
  0xff   :  { %v475_v44 = vmul.f32 0.015625, %v450_v33  ;;  %v463_v47 = vadd.f32 %v462_v41, %v461_v40 }
 0x100   :  { %v3339_v48 = vsub.f32 %v3220_v54, %v473_v42  ;;  %v3342_v55 = vsub.f32 %v3214_v51, %v473_v42  ;;  %v3345_v57 = vsub.f32 %v3234_v63, %v473_v42  ;;  %v3348_v58 = vsub.f32 %v3230_v61, %v473_v42 }
 0x101   :  { %v3351_v59 = vsub.f32 %v3250_v9, %v473_v42  ;;  %v3354_v60 = vsub.f32 %v3246_v7, %v473_v42  ;;  %v3357_v1 = vsub.f32 %v3266_v21, %v473_v42  ;;  %v3360_v54 = vsub.f32 %v3262_v19, %v473_v42 }
 0x102   :  { %v509_v51 = vmul.f32 %v3339_v48, %v3339_v48  ;;  %v510_v63 = vmul.f32 %v3342_v55, %v3342_v55  ;;  %v511_v61 = vmul.f32 %v3345_v57, %v3345_v57  ;;  %v512_v9 = vmul.f32 %v3348_v58, %v3348_v58 }
 0x103   :  { %v513_v19 = vmul.f32 %v3351_v59, %v3351_v59  ;;  %v514_v2 = vmul.f32 %v3354_v60, %v3354_v60  ;;  %v3379_v13 = vsub.f32 %v3224_v56, %v475_v44  ;;  %v3382_v15 = vsub.f32 %v3216_v52, %v475_v44 }
 0x104   :  { %v541_v7 = vsel %vm387_vm1, %v509_v51, 0.0  ;;  %v542_v21 = vsel %vm387_vm1, %v510_v63, 0.0  ;;  %v544_v6 = vsel %vm387_vm1, %v511_v61, 0.0  ;;  %v546_v10 = vsel %vm387_vm1, %v512_v9, 0.0 }
 0x105   :  { %v543_v3 = vadd.f32 %v542_v21, %v541_v7  ;;  %v3385_v16 = vsub.f32 %v3236_v0, %v475_v44  ;;  %v3388_v18 = vsub.f32 %v3232_v62, %v475_v44  ;;  %v3391_v22 = vsub.f32 %v3252_v11, %v475_v44 }
 0x106   :  { %v3394_v24 = vsub.f32 %v3248_v8, %v475_v44  ;;  %v3397_v25 = vsub.f32 %v3268_v23, %v475_v44  ;;  %v3400_v56 = vsub.f32 %v3264_v20, %v475_v44  ;;  %v525_v52 = vmul.f32 %v3379_v13, %v3379_v13 }
 0x107   :  { %v545_v17 = vadd.f32 %v544_v6, %v543_v3  ;;  %v526_v0 = vmul.f32 %v3382_v15, %v3382_v15  ;;  %v527_v11 = vmul.f32 %v3385_v16, %v3385_v16  ;;  %v528_v8 = vmul.f32 %v3388_v18, %v3388_v18 }
 0x108   :  { %v422_v23 = vsel %vm387_vm1, %v3326_v27, 0.0  ;;  %v515_v20 = vmul.f32 %v3357_v1, %v3357_v1  ;;  %v548_v26 = vsel %vm387_vm1, %v513_v19, 0.0  ;;  %v583_v28 = vsel %vm387_vm1, %v525_v52, 0.0 }
 0x109   :  { %v547_v62 = vadd.f32 %v546_v10, %v545_v17  ;;  %v529_v35 = vmul.f32 %v3391_v22, %v3391_v22  ;;  %v584_v39 = vsel %vm387_vm1, %v526_v0, 0.0  ;;  %v586_v40 = vsel %vm387_vm1, %v527_v11, 0.0 }
 0x10a   :  { %v516_v41 = vmul.f32 %v3360_v54, %v3360_v54  ;;  %v550_v42 = vsel %vm387_vm1, %v514_v2, 0.0  ;;  %v530_v44 = vmul.f32 %v3394_v24, %v3394_v24  ;;  %v585_v51 = vadd.f32 %v584_v39, %v583_v28 }
 0x10b   :  { %v549_v33 = vadd.f32 %v548_v26, %v547_v62  ;;  %v588_v61 = vsel %vm387_vm1, %v528_v8, 0.0  ;;  %v423_v9 = vadd.f32 %v422_v23, %v421_v43  ;;  %v465_v7 = vadd.f32 %v464_v30, %v463_v47 }
 0x10c   :  { %v552_v21 = vsel %vm387_vm1, %v515_v20, 0.0  ;;  %v531_v19 = vmul.f32 %v3397_v25, %v3397_v25  ;;  %v587_v3 = vadd.f32 %v586_v40, %v585_v51  ;;  %v590_v10 = vsel %vm387_vm1, %v529_v35, 0.0 }
 0x10d   :  { %v551_v63 = vadd.f32 %v550_v42, %v549_v33  ;;  %v424_v17 = vrot.slane %v423_v9, 4  ;;  %v466_v2 = vrot.slane %v465_v7, 4  ;;  %v3001_v52 = vmov 0.0|0.0  }
 0x10e   :  { %2825 = vmatprep.subr.bf16.mxu1 %v3001_v52  ;;  %2873 = vmatprep.subr.bf16.mxu0 %v3001_v52  ;;  %v554_v0 = vsel %vm387_vm1, %v516_v41, 0.0  ;;  %v532_v43 = vmul.f32 %v3400_v56, %v3400_v56  ;;  %v589_v47 = vadd.f32 %v588_v61, %v587_v3  ;;  %v592_v11 = vsel %vm387_vm1, %v530_v44, 0.0 }
 0x10f   :  { %v553_v6 = vadd.f32 %v552_v21, %v551_v63  ;;  %v425_v8 = vadd.f32 %v424_v17, %v423_v9  ;;  %v467_v23 = vadd.f32 %v466_v2, %v465_v7  ;;  %v594_v28 = vsel %vm387_vm1, %v531_v19, 0.0 }
 0x110   :  { %v591_v20 = vadd.f32 %v590_v10, %v589_v47  ;;  %v596_v40 = vsel %vm387_vm1, %v532_v43, 0.0 }
 0x111   :  { %v555_v62 = vadd.f32 %v554_v0, %v553_v6  ;;  %v426_v30 = vrot.slane %v425_v8, 2  ;;  %v468_v33 = vrot.slane %v467_v23, 2 }
 0x112   :  { %v593_v35 = vadd.f32 %v592_v11, %v591_v20 }
 0x113   :  { %v556_v26 = vrot.slane %v555_v62, 4  ;;  %v427_v41 = vadd.f32 %v426_v30, %v425_v8  ;;  %v469_v42 = vadd.f32 %v468_v33, %v467_v23 }
 0x114   :  { %v595_v51 = vadd.f32 %v594_v28, %v593_v35 }
 0x115   :  { %v557_v39 = vadd.f32 %v556_v26, %v555_v62  ;;  %v428_v61 = vrot.slane %v427_v41, 1  ;;  %v470_v3 = vrot.slane %v469_v42, 1 }
 0x116   :  { %v597_v21 = vadd.f32 %v596_v40, %v595_v51 }
 0x117   :  { %v558_v63 = vrot.slane %v557_v39, 2  ;;  %v429_v9 = vadd.f32 %v428_v61, %v427_v41  ;;  %v471_v19 = vadd.f32 %v470_v3, %v469_v42 }
 0x118   :  { %v598_v7 = vrot.slane %v597_v21, 4 }
 0x119   :  { %v559_v44 = vadd.f32 %v558_v63, %v557_v39  ;;  %v474_v10 = vmul.f32 0.015625, %v429_v9  ;;  %v476_v30 = vmul.f32 0.015625, %v471_v19 }
 0x11a   :  { %v599_v17 = vadd.f32 %v598_v7, %v597_v21 }
 0x11b   :  { %v560_v6 = vrot.slane %v559_v44, 1  ;;  %v3441_v0 = vsub.f32 %v3284_v36, %v474_v10  ;;  %v3444_v43 = vsub.f32 %v3278_v31, %v474_v10  ;;  %v3447_v47 = vsub.f32 %v3298_v49, %v474_v10 }
 0x11c   :  { %v600_v62 = vrot.slane %v599_v17, 2  ;;  %v3450_v11 = vsub.f32 %v3294_v45, %v474_v10  ;;  %v3453_v8 = vsub.f32 %v3314_v12, %v474_v10  ;;  %v3456_v23 = vsub.f32 %v3310_v4, %v474_v10 }
 0x11d   :  { %v561_v2 = vadd.f32 %v560_v6, %v559_v44  ;;  %v3459_v36 = vsub.f32 %v3330_v34, %v474_v10  ;;  %v3462_v31 = vsub.f32 %v3326_v27, %v474_v10  ;;  %v517_v49 = vmul.f32 %v3441_v0, %v3441_v0 }
 0x11e   :  { %v601_v26 = vadd.f32 %v600_v62, %v599_v17  ;;  %v518_v45 = vmul.f32 %v3444_v43, %v3444_v43  ;;  %v519_v12 = vmul.f32 %v3447_v47, %v3447_v47  ;;  %v520_v4 = vmul.f32 %v3450_v11, %v3450_v11 }
 0x11f   :  { %v625_v20 = vmul.f32 0.015625, %v561_v2  ;;  %v521_v34 = vmul.f32 %v3453_v8, %v3453_v8  ;;  %v562_v33 = vsel %vm387_vm1, %v517_v49, 0.0  ;;  %v522_v39 = vmul.f32 %v3456_v23, %v3456_v23 }
 0x120   :  { %v602_v27 = vrot.slane %v601_v26, 1  ;;  %v563_v35 = vsel %vm387_vm1, %v518_v45, 0.0  ;;  %v523_v40 = vmul.f32 %v3459_v36, %v3459_v36  ;;  %v524_v51 = vmul.f32 %v3462_v31, %v3462_v31 }
 0x121   :  { %v629_v28 = vadd.f32 1e-05, %v625_v20  ;;  %v564_v41 = vadd.f32 %v563_v35, %v562_v33  ;;  %v565_v63 = vsel %vm387_vm1, %v519_v12, 0.0  ;;  %v567_v61 = vsel %vm387_vm1, %v520_v4, 0.0  ;;  %v3532_v33 = vld [vmem:[%s4515_s3] ss:$0 sm:$0xff] }
 0x122   :  { %v603_v42 = vadd.f32 %v602_v27, %v601_v26  ;;  %v569_v3 = vsel %vm387_vm1, %v521_v34, 0.0  ;;  %v3486_v44 = vsub.f32 %v3288_v38, %v476_v30  ;;  %v3489_v9 = vsub.f32 %v3280_v32, %v476_v30 }
 0x123   :  { %2928 = vrsqrt.f32 %v629_v28  ;;  %v566_v21 = vadd.f32 %v565_v63, %v564_v41  ;;  %v3492_v6 = vsub.f32 %v3300_v53, %v476_v30  ;;  %v3495_v10 = vsub.f32 %v3296_v46, %v476_v30 }
 0x124   :  { %v627_v7 = vmul.f32 0.015625, %v603_v42  ;;  %v3498_v17 = vsub.f32 %v3316_v14, %v476_v30  ;;  %v3501_v2 = vsub.f32 %v3312_v5, %v476_v30  ;;  %v3504_v38 = vsub.f32 %v3332_v37, %v476_v30 }
 0x125   :  { %v568_v19 = vadd.f32 %v567_v61, %v566_v21  ;;  %v3507_v32 = vsub.f32 %v3328_v29, %v476_v30  ;;  %v533_v53 = vmul.f32 %v3486_v44, %v3486_v44  ;;  %v534_v46 = vmul.f32 %v3489_v9, %v3489_v9  ;;  %v1621_v21 = vld [vmem:[%s4516_s7] sm:$0xff] }
 0x126   :  { %v631_v62 = vadd.f32 1e-05, %v627_v7  ;;  %v535_v14 = vmul.f32 %v3492_v6, %v3492_v6  ;;  %v536_v5 = vmul.f32 %v3495_v10, %v3495_v10  ;;  %v537_v37 = vmul.f32 %v3498_v17, %v3498_v17 }
 0x127   :  { %v570_v20 = vadd.f32 %v569_v3, %v568_v19  ;;  %v571_v29 = vsel %vm387_vm1, %v522_v39, 0.0  ;;  %v604_v49 = vsel %vm387_vm1, %v533_v53, 0.0  ;;  %v605_v45 = vsel %vm387_vm1, %v534_v46, 0.0  ;;  %v1622_v3 = vld [vmem:[%s4516_s7 + $0x8] sm:$0xff]  ;;  %v1624_v53 = vld [vmem:[%s4516_s7 + $0x18] sm:$0xff] }
 0x128   :  { %2930 = vrsqrt.f32 %v631_v62  ;;  %v607_v12 = vsel %vm387_vm1, %v535_v14, 0.0  ;;  %v573_v4 = vsel %vm387_vm1, %v523_v40, 0.0  ;;  %v575_v28 = vsel %vm387_vm1, %v524_v51, 0.0  ;;  %v1623_v62 = vld [vmem:[%s4516_s7 + $0x10] sm:$0xff] }
 0x129   :  { %v572_v26 = vadd.f32 %v571_v29, %v570_v20  ;;  %v538_v34 = vmul.f32 %v3501_v2, %v3501_v2  ;;  %v606_v30 = vadd.f32 %v605_v45, %v604_v49  ;;  %v539_v39 = vmul.f32 %v3504_v38, %v3504_v38  ;;  %v747_v29 = vld [vmem:[%s4518_s1] sm:$0xff] }
 0x12a   :  { %v609_v41 = vsel %vm387_vm1, %v536_v5, 0.0  ;;  %v611_v40 = vsel %vm387_vm1, %v537_v37, 0.0  ;;  %v540_v5 = vmul.f32 %v3507_v32, %v3507_v32  ;;  %v2826_v49 = vpack.c.bf16 %v1622_v3, %v1621_v21 }
 0x12b   :  { %v574_v35 = vadd.f32 %v573_v4, %v572_v26  ;;  %v608_v51 = vadd.f32 %v607_v12, %v606_v30  ;;  %v613_v37 = vsel %vm387_vm1, %v538_v34, 0.0  ;;  %v3585_v4 = vpack.c.bf16 %v1624_v53, %v1623_v62  ;;  %v1628_v34 = vld [vmem:[%s4516_s7 + $0x38] sm:$0xff] }
 0x12d   :  { %v3527_v27 = vpop.eup %2928  ;;  %v576_v7 = vadd.f32 %v575_v28, %v574_v35  ;;  %v610_v46 = vadd.f32 %v609_v41, %v608_v51  ;;  %v1627_v28 = vld [vmem:[%s4516_s7 + $0x30] sm:$0xff]  ;;  %v615_v35 = vsel %vm387_vm1, %v539_v39, 0.0  ;;  %v617_v39 = vsel %vm387_vm1, %v540_v5, 0.0 }
 0x12e   :  { %v3540_v42 = vmul.f32 %v3527_v27, %v3357_v1  ;;  %v637_v63 = vmul.f32 %v3527_v27, %v3339_v48  ;;  %v638_v61 = vmul.f32 %v3527_v27, %v3342_v55  ;;  %v3555_v1 = vld [vmem:[%s4517_s4] ss:$0 sm:$0xff]  ;;  %v639_v48 = vmul.f32 %v3527_v27, %v3345_v57 }
 0x12f   :  { %v640_v55 = vmul.f32 %v3527_v27, %v3348_v58  ;;  %v641_v19 = vmul.f32 %v3527_v27, %v3351_v59  ;;  %v1625_v57 = vld [vmem:[%s4516_s7 + $0x20] sm:$0xff]  ;;  %v1626_v58 = vld [vmem:[%s4516_s7 + $0x28] sm:$0xff]  ;;  %v577_v59 = vrot.slane %v576_v7, 4  ;;  %v612_v26 = vadd.f32 %v611_v40, %v610_v46 }
 0x130   :  { %v676_v14 = vmul.f32 %v3532_v33, %v637_v63  ;;  %v677_v20 = vmul.f32 %v3532_v33, %v638_v61  ;;  %v678_v12 = vmul.f32 %v3532_v33, %v639_v48  ;;  %v3595_v40 = vpack.c.bf16 %v1626_v58, %v1625_v57 }
 0x131   :  { %v578_v30 = vadd.f32 %v577_v59, %v576_v7  ;;  %v679_v41 = vmul.f32 %v3532_v33, %v640_v55  ;;  %v614_v63 = vadd.f32 %v613_v37, %v612_v26  ;;  %v642_v3 = vmul.f32 %v3527_v27, %v3354_v60  ;;  %v748_v55 = vld [vmem:[%s4518_s1 + $0x8] sm:$0xff]  ;;  %v750_v26 = vld [vmem:[%s4518_s1 + $0x18] sm:$0xff] }
 0x132   :  { %v715_v45 = vadd.f32 %v3555_v1, %v676_v14  ;;  %v3597_v51 = vpop.eup %2930  ;;  %v716_v21 = vadd.f32 %v3555_v1, %v677_v20  ;;  %v3610_v62 = vpack.c.bf16 %v1628_v34, %v1627_v28  ;;  %v717_v60 = vadd.f32 %v3555_v1, %v678_v12  ;;  %v749_v20 = vld [vmem:[%s4518_s1 + $0x10] sm:$0xff] }
 0x133   :  { %v659_v48 = vmul.f32 %v3597_v51, %v3397_v25  ;;  %v579_v7 = vrot.slane %v578_v30, 2  ;;  %v616_v53 = vadd.f32 %v615_v35, %v614_v63  ;;  %v680_v25 = vmul.f32 %v3532_v33, %v641_v19  ;;  %v764_v63 = vld [vmem:[%s4518_s1 + $0x88] sm:$0xff] }
 0x134   :  { %v3599_v61 = vmul.f32 %v747_v29, %v715_v45  ;;  %v718_v57 = vadd.f32 %v3555_v1, %v679_v41  ;;  %v3625_v59 = vmul.f32 %v748_v55, %v716_v21  ;;  %v3629_v5 = vmul.f32 %v3527_v27, %v3360_v54  ;;  %v765_v21 = vld [vmem:[%s4518_s1 + $0x90] sm:$0xff] }
 0x135   :  { %v698_v46 = vmul.f32 %v3532_v33, %v659_v48  ;;  %v580_v14 = vadd.f32 %v579_v7, %v578_v30  ;;  %v618_v58 = vadd.f32 %v617_v39, %v616_v53  ;;  %v653_v19 = vmul.f32 %v3597_v51, %v3379_v13 }
 0x136   :  { %2493 = vmatmul.mubr.msk.f32.vlgmr.msra.gmra.mrb[16].mxu1 %vm387_vm1, %v3599_v61  ;;  %2525 = vmatmul.mubr.msk.f32.vlgmr.msra.gmra.mrb[16].mxu0 %vm387_vm1, %v3599_v61  ;;  %v654_v45 = vmul.f32 %v3597_v51, %v3382_v15  ;;  %v655_v12 = vmul.f32 %v3597_v51, %v3385_v16  ;;  %v3646_v13 = vmul.f32 %v749_v20, %v717_v60  ;;  %v763_v16 = vld [vmem:[%s4518_s1 + $0x80] sm:$0xff]  ;;  %v769_v60 = vld [vmem:[%s4518_s1 + $0xb0] sm:$0xff]  ;;  %v1630_v20 = vld [vmem:[%s4516_s7 + $0x48] sm:$0xff] }
 0x137   :  { %981 = vmatprep.mubr.f32.mxu1 %v3000_v50  ;;  %1242 = vmatprep.mubr.f32.mxu0 %v3000_v50  ;;  %v737_v37 = vadd.f32 %v3555_v1, %v698_v46  ;;  %v581_v29 = vrot.slane %v580_v14, 1  ;;  %v619_v54 = vrot.slane %v618_v58, 4  ;;  %v719_v27 = vadd.f32 %v3555_v1, %v680_v25 }
 0x138   :  { %2827 = vmatpush1.bf16.msra.mxu1 %v2826_v49  ;;  %2875 = vmatpush1.bf16.msra.mxu0 %v2826_v49  ;;  %v692_v28 = vmul.f32 %v3532_v33, %v653_v19  ;;  %v693_v49 = vmul.f32 %v3532_v33, %v654_v45  ;;  %v694_v34 = vmul.f32 %v3532_v33, %v655_v12  ;;  %v766_v19 = vld [vmem:[%s4518_s1 + $0x98] sm:$0xff]  ;;  %v751_v45 = vld [vmem:[%s4518_s1 + $0x20] sm:$0xff] }
 0x139   :  { %2828 = vmatprep.subr.bf16.mxu1 %v3001_v52  ;;  %v582_v15 = vadd.f32 %v581_v29, %v580_v14  ;;  %v620_v30 = vadd.f32 %v619_v54, %v618_v58  ;;  %v3657_v35 = vmul.f32 %v750_v26, %v718_v57  ;;  %v656_v48 = vmul.f32 %v3597_v51, %v3388_v18  ;;  %v1629_v14 = vld [vmem:[%s4516_s7 + $0x40] sm:$0xff] }
 0x13a   :  { %2494 = vmatmul.mubr.msk.f32.gmra.mrb[18].mxu1 %vm387_vm1, %v3625_v59  ;;  %2526 = vmatmul.mubr.msk.f32.gmra.mrb[18].mxu0 %vm387_vm1, %v3625_v59  ;;  %v731_v41 = vadd.f32 %v3555_v1, %v692_v28  ;;  %v732_v39 = vadd.f32 %v3555_v1, %v693_v49  ;;  %v733_v55 = vadd.f32 %v3555_v1, %v694_v34  ;;  %v767_v54 = vld [vmem:[%s4518_s1 + $0xa0] sm:$0xff] }
 0x13b   :  { %987 = vmatprep.mubr.f32.mxu1 %v3000_v50  ;;  %1248 = vmatprep.mubr.f32.mxu0 %v3000_v50  ;;  %v626_v7 = vmul.f32 0.015625, %v582_v15  ;;  %v657_v53 = vmul.f32 %v3597_v51, %v3391_v22  ;;  %v621_v25 = vrot.slane %v620_v30, 2  ;;  %v681_v18 = vmul.f32 %v3532_v33, %v642_v3 }
 0x13c   :  { %2830 = vmatpush1.bf16.msra.mxu1 %v3585_v4  ;;  %2876 = vmatprep.subr.bf16.mxu0 %v3001_v52  ;;  %v3683_v46 = vmul.f32 %v763_v16, %v731_v41  ;;  %v695_v22 = vmul.f32 %v3532_v33, %v656_v48  ;;  %v3694_v58 = vmul.f32 %v764_v63, %v732_v39 }
 0x13d   :  { %2831 = vmatprep.subr.bf16.mxu1 %v3001_v52  ;;  %v630_v57 = vadd.f32 1e-05, %v626_v7  ;;  %v3696_v3 = vmul.f32 %v765_v21, %v733_v55  ;;  %v696_v29 = vmul.f32 %v3532_v33, %v657_v53  ;;  %v622_v26 = vadd.f32 %v621_v25, %v620_v30  ;;  %2878 = vmatpush1.bf16.msra.mxu0 %v3585_v4  ;;  %v770_v7 = vld [vmem:[%s4518_s1 + $0xb8] sm:$0xff]  ;;  %v1631_v55 = vld [vmem:[%s4516_s7 + $0x50] sm:$0xff] }
 0x13e   :  { %2495 = vmatmul.mubr.msk.f32.gmra.mrb[20].mxu1 %vm387_vm1, %v3646_v13  ;;  %2527 = vmatmul.mubr.msk.f32.gmra.mrb[20].mxu0 %vm387_vm1, %v3646_v13  ;;  %v734_v12 = vadd.f32 %v3555_v1, %v695_v22  ;;  %v658_v28 = vmul.f32 %v3597_v51, %v3394_v24  ;;  %v3711_v15 = vmul.f32 %v769_v60, %v737_v37  ;;  %v1632_v53 = vld [vmem:[%s4516_s7 + $0x58] sm:$0xff] }
 0x13f   :  { %993 = vmatprep.mubr.f32.mxu1 %v3000_v50  ;;  %1254 = vmatprep.mubr.f32.mxu0 %v3000_v50  ;;  %2932 = vrsqrt.f32 %v630_v57  ;;  %v735_v16 = vadd.f32 %v3555_v1, %v696_v29  ;;  %v660_v49 = vmul.f32 %v3597_v51, %v3400_v56  ;;  %v3719_v34 = vpack.c.bf16 %v1630_v20, %v1629_v14  ;;  %v753_v57 = vld [vmem:[%s4518_s1 + $0x30] sm:$0xff] }
 0x140   :  { %2833 = vmatpush1.bf16.msra.mxu1 %v3595_v40  ;;  %v682_v30 = vmul.f32 %v3532_v33, %v3540_v42  ;;  %v623_v24 = vrot.slane %v622_v26, 1  ;;  %v3727_v37 = vmul.f32 %v766_v19, %v734_v12  ;;  %v697_v56 = vmul.f32 %v3532_v33, %v658_v28  ;;  %v768_v42 = vld [vmem:[%s4518_s1 + $0xa8] sm:$0xff]  ;;  %2879 = vmatprep.subr.bf16.mxu0 %v3001_v52 }
 0x141   :  { %2834 = vmatprep.subr.bf16.mxu1 %v3001_v52  ;;  %v3732_v4 = vmul.f32 %v751_v45, %v719_v27  ;;  %v3734_v51 = vmul.f32 %v767_v54, %v735_v16  ;;  %v699_v41 = vmul.f32 %v3532_v33, %v660_v49  ;;  %v720_v21 = vadd.f32 %v3555_v1, %v681_v18  ;;  %v752_v27 = vld [vmem:[%s4518_s1 + $0x28] sm:$0xff]  ;;  %v754_v45 = vld [vmem:[%s4518_s1 + $0x38] sm:$0xff] }
 0x142   :  { %2496 = vmatmul.mubr.msk.f32.gmra.mrb[22].mxu1 %vm387_vm1, %v3657_v35  ;;  %2528 = vmatmul.mubr.msk.f32.gmra.mrb[22].mxu0 %vm387_vm1, %v3657_v35  ;;  %v624_v63 = vadd.f32 %v623_v24, %v622_v26  ;;  %v736_v48 = vadd.f32 %v3555_v1, %v697_v56  ;;  %v683_v18 = vmul.f32 %v3532_v33, %v3629_v5 }
 0x143   :  { %999 = vmatprep.mubr.f32.mxu1 %v3000_v50  ;;  %1260 = vmatprep.mubr.f32.mxu0 %v3000_v50  ;;  %v738_v39 = vadd.f32 %v3555_v1, %v699_v41  ;;  %v3772_v20 = vmul.f32 %v752_v27, %v720_v21  ;;  %v3779_v19 = vpack.c.bf16 %v1632_v53, %v1631_v55  ;;  %v1637_v21 = vld [vmem:[%s4516_s7 + $0x80] sm:$0xff] }
 0x144   :  { %2836 = vmatpush1.bf16.msra.mxu1 %v3610_v62  ;;  %2881 = vmatpush1.bf16.msra.mxu0 %v3595_v40  ;;  %v628_v60 = vmul.f32 0.015625, %v624_v63  ;;  %v3763_v25 = vmul.f32 %v768_v42, %v736_v48  ;;  %v721_v40 = vadd.f32 %v3555_v1, %v682_v30  ;;  %v722_v26 = vadd.f32 %v3555_v1, %v683_v18  ;;  %v1636_v63 = vld [vmem:[%s4516_s7 + $0x78] sm:$0xff]  ;;  %v1638_v48 = vld [vmem:[%s4516_s7 + $0x88] sm:$0xff] }
 0x145   :  { %2837 = vmatprep.subr.bf16.mxu1 %v3001_v52  ;;  %v3770_v22 = vmul.f32 %v770_v7, %v738_v39  ;;  %2882 = vmatprep.subr.bf16.mxu0 %v3001_v52  ;;  %v755_v7 = vld [vmem:[%s4518_s1 + $0x40] sm:$0xff]  ;;  %v757_v39 = vld [vmem:[%s4518_s1 + $0x50] sm:$0xff] }
 0x146   :  { %2497 = vmatmul.mubr.msk.f32.gmra.mrb[24].mxu1 %vm387_vm1, %v3732_v4  ;;  %2529 = vmatmul.mubr.msk.f32.gmra.mrb[24].mxu0 %vm387_vm1, %v3732_v4  ;;  %v632_v14 = vadd.f32 1e-05, %v628_v60  ;;  %v3789_v29 = vmul.f32 %v753_v57, %v721_v40  ;;  %v3868_v60 = vpack.c.bf16 %v1638_v48, %v1637_v21 }
 0x147   :  { %1005 = vmatprep.mubr.f32.mxu1 %v3000_v50  ;;  %1266 = vmatprep.mubr.f32.mxu0 %v3000_v50 }
 0x148   :  { %2839 = vmatpush1.bf16.msra.mxu1 %v3719_v34  ;;  %2884 = vmatpush1.bf16.msra.mxu0 %v3610_v62  ;;  %2934 = vrsqrt.f32 %v632_v14 }
 0x149   :  { %2840 = vmatprep.subr.bf16.mxu1 %v3001_v52  ;;  %v2933_v5 = vpop.eup %2932  ;;  %2885 = vmatprep.subr.bf16.mxu0 %v3001_v52 }
 0x14a   :  { %2498 = vmatmul.mubr.msk.f32.gmra.mrb[26].mxu1 %vm387_vm1, %v3772_v20  ;;  %2530 = vmatmul.mubr.msk.f32.gmra.mrb[26].mxu0 %vm387_vm1, %v3772_v20  ;;  %v3793_v62 = vmul.f32 %v2933_v5, %v3459_v36  ;;  %v645_v12 = vmul.f32 %v2933_v5, %v3441_v0  ;;  %v646_v54 = vmul.f32 %v2933_v5, %v3444_v43  ;;  %v1633_v0 = vld [vmem:[%s4516_s7 + $0x60] sm:$0xff]  ;;  %v1634_v43 = vld [vmem:[%s4516_s7 + $0x68] sm:$0xff] }
 0x14b   :  { %1011 = vmatprep.mubr.f32.mxu1 %v3000_v50  ;;  %1272 = vmatprep.mubr.f32.mxu0 %v3000_v50  ;;  %v647_v28 = vmul.f32 %v2933_v5, %v3447_v47  ;;  %v648_v16 = vmul.f32 %v2933_v5, %v3450_v11  ;;  %v649_v49 = vmul.f32 %v2933_v5, %v3453_v8 }
 0x14c   :  { %2842 = vmatpush1.bf16.msra.mxu1 %v3779_v19  ;;  %v3805_v30 = vmul.f32 %v2933_v5, %v3456_v23  ;;  %v3808_v36 = vmul.f32 %v2933_v5, %v3462_v31  ;;  %v684_v47 = vmul.f32 %v3532_v33, %v645_v12  ;;  %v685_v11 = vmul.f32 %v3532_v33, %v646_v54  ;;  %v1635_v31 = vld [vmem:[%s4516_s7 + $0x70] sm:$0xff] }
 0x14d   :  { %v3825_v8 = vmul.f32 %v754_v45, %v722_v26  ;;  %v686_v23 = vmul.f32 %v3532_v33, %v647_v28  ;;  %v687_v42 = vmul.f32 %v3532_v33, %v648_v16  ;;  %2887 = vmatpush1.bf16.msra.mxu0 %v3719_v34  ;;  %v3835_v41 = vpack.c.bf16 %v1634_v43, %v1633_v0  ;;  %v756_v34 = vld [vmem:[%s4518_s1 + $0x48] sm:$0xff]  ;;  %v773_v16 = vld [vmem:[%s4518_s1 + $0xd0] sm:$0xff] }
 0x14e   :  { %2499 = vmatmul.mubr.msk.f32.gmra.mrb[28].mxu1 %vm387_vm1, %v3789_v29  ;;  %2531 = vmatmul.mubr.msk.f32.gmra.mrb[28].mxu0 %vm387_vm1, %v3789_v29  ;;  %v723_v24 = vadd.f32 %v3555_v1, %v684_v47  ;;  %v724_v56 = vadd.f32 %v3555_v1, %v685_v11  ;;  %v3864_v55 = vmul.f32 %v3532_v33, %v649_v49 }
 0x14f   :  { %1017 = vmatprep.mubr.f32.mxu1 %v3000_v50  ;;  %1278 = vmatprep.mubr.f32.mxu0 %v3000_v50  ;;  %v725_v27 = vadd.f32 %v3555_v1, %v686_v23  ;;  %v3866_v53 = vpack.c.bf16 %v1636_v63, %v1635_v31  ;;  %v3875_v57 = vadd.f32 %v3555_v1, %v687_v42  ;;  %v774_v31 = vld [vmem:[%s4518_s1 + $0xd8] sm:$0xff] }
 0x150   :  { %2843 = vmatprep.subr.bf16.mxu1 %v3001_v52  ;;  %v3870_v18 = vmul.f32 %v755_v7, %v723_v24  ;;  %v3872_v14 = vmul.f32 %v756_v34, %v724_v56  ;;  %2888 = vmatprep.subr.bf16.mxu0 %v3001_v52  ;;  %v775_v24 = vld [vmem:[%s4518_s1 + $0xe0] sm:$0xff] }
 0x151   :  { %2845 = vmatpush1.bf16.msra.mxu1 %v3835_v41  ;;  %2890 = vmatpush1.bf16.msra.mxu0 %v3779_v19  ;;  %v3888_v54 = vmul.f32 %v757_v39, %v725_v27  ;;  %v771_v19 = vld [vmem:[%s4518_s1 + $0xc0] sm:$0xff] }
 0x152   :  { %2500 = vmatmul.mubr.msk.f32.gmra.mrb[30].mxu1 %vm387_vm1, %v3825_v8  ;;  %2532 = vmatmul.mubr.msk.f32.gmra.mrb[30].mxu0 %vm387_vm1, %v3825_v8  ;;  %v2935_v40 = vpop.eup %2934 }
 0x153   :  { %1023 = vmatprep.mubr.f32.mxu1 %v3000_v50  ;;  %1284 = vmatprep.mubr.f32.mxu0 %v3000_v50  ;;  %v667_v5 = vmul.f32 %v2935_v40, %v3504_v38  ;;  %v661_v26 = vmul.f32 %v2935_v40, %v3486_v44  ;;  %v662_v45 = vmul.f32 %v2935_v40, %v3489_v9 }
 0x154   :  { %v663_v12 = vmul.f32 %v2935_v40, %v3492_v6  ;;  %v664_v28 = vmul.f32 %v2935_v40, %v3495_v10  ;;  %v665_v38 = vmul.f32 %v2935_v40, %v3498_v17  ;;  %v772_v10 = vld [vmem:[%s4518_s1 + $0xc8] sm:$0xff]  ;;  %v666_v43 = vmul.f32 %v2935_v40, %v3501_v2  ;;  %2846 = vmatprep.subr.bf16.mxu1 %v3001_v52  ;;  %v777_v2 = vld [vmem:[%s4518_s1 + $0xf0] sm:$0xff] }
 0x155   :  { %v706_v44 = vmul.f32 %v3532_v33, %v667_v5  ;;  %v700_v9 = vmul.f32 %v3532_v33, %v661_v26  ;;  %v701_v6 = vmul.f32 %v3532_v33, %v662_v45  ;;  %v668_v56 = vmul.f32 %v2935_v40, %v3507_v32  ;;  %2848 = vmatpush1.bf16.msra.mxu1 %v3866_v53  ;;  %v776_v40 = vld [vmem:[%s4518_s1 + $0xe8] sm:$0xff]  ;;  %v1639_v26 = vld [vmem:[%s4516_s7 + $0x90] sm:$0xff]  ;;  %v1640_v45 = vld [vmem:[%s4516_s7 + $0x98] sm:$0xff] }
 0x156   :  { %2501 = vmatmul.mubr.msk.f32.gmra.mrb[32].mxu1 %vm387_vm1, %v3870_v18  ;;  %2533 = vmatmul.mubr.msk.f32.gmra.mrb[32].mxu0 %vm387_vm1, %v3870_v18  ;;  %v702_v17 = vmul.f32 %v3532_v33, %v663_v12  ;;  %v703_v49 = vmul.f32 %v3532_v33, %v664_v28  ;;  %v704_v0 = vmul.f32 %v3532_v33, %v665_v38  ;;  %v758_v12 = vld [vmem:[%s4518_s1 + $0x58] sm:$0xff] }
 0x157   :  { %1029 = vmatprep.mubr.f32.mxu1 %v3000_v50  ;;  %1290 = vmatprep.mubr.f32.mxu0 %v3000_v50  ;;  %v745_v47 = vadd.f32 %v3555_v1, %v706_v44  ;;  %v739_v11 = vadd.f32 %v3555_v1, %v700_v9  ;;  %v740_v23 = vadd.f32 %v3555_v1, %v701_v6  ;;  %v778_v44 = vld [vmem:[%s4518_s1 + $0xf8] sm:$0xff] }
 0x158   :  { %v741_v42 = vadd.f32 %v3555_v1, %v702_v17  ;;  %v742_v63 = vadd.f32 %v3555_v1, %v703_v49  ;;  %v743_v21 = vadd.f32 %v3555_v1, %v704_v0  ;;  %v705_v7 = vmul.f32 %v3532_v33, %v666_v43  ;;  %2891 = vmatprep.subr.bf16.mxu0 %v3001_v52  ;;  %v1642_v49 = vld [vmem:[%s4516_s7 + $0xa8] sm:$0xff] }
 0x159   :  { %v3934_v48 = vmul.f32 %v771_v19, %v739_v11  ;;  %v3936_v32 = vmul.f32 %v772_v10, %v740_v23  ;;  %v3948_v5 = vmul.f32 %v777_v2, %v745_v47  ;;  %v707_v38 = vmul.f32 %v3532_v33, %v668_v56  ;;  %2893 = vmatpush1.bf16.msra.mxu0 %v3835_v41  ;;  %v1643_v47 = vld [vmem:[%s4516_s7 + $0xb0] sm:$0xff]  ;;  %v1644_v11 = vld [vmem:[%s4516_s7 + $0xb8] sm:$0xff]  ;;  %v760_v23 = vld [vmem:[%s4518_s1 + $0x68] sm:$0xff] }
 0x15a   :  { %2502 = vmatmul.mubr.msk.f32.gmra.mrb[34].mxu1 %vm387_vm1, %v3872_v14  ;;  %2534 = vmatmul.mubr.msk.f32.gmra.mrb[34].mxu0 %vm387_vm1, %v3872_v14  ;;  %v3939_v34 = vmul.f32 %v773_v16, %v741_v42  ;;  %v3941_v27 = vmul.f32 %v774_v31, %v742_v63  ;;  %v3943_v39 = vmul.f32 %v775_v24, %v743_v21  ;;  %v1641_v16 = vld [vmem:[%s4516_s7 + $0xa0] sm:$0xff]  ;;  %v761_v2 = vld [vmem:[%s4518_s1 + $0x70] sm:$0xff]  ;;  %v1646_v42 = vld [vmem:[%s4516_s7 + $0xc8] sm:$0xff] }
 0x15b   :  { %1035 = vmatprep.mubr.f32.mxu1 %v3000_v50  ;;  %1296 = vmatprep.mubr.f32.mxu0 %v3000_v50  ;;  %v744_v28 = vadd.f32 %v3555_v1, %v705_v7  ;;  %v746_v41 = vadd.f32 %v3555_v1, %v707_v38  ;;  %v2853_v6 = vpack.c.bf16 %v1640_v45, %v1639_v26  ;;  %v1645_v56 = vld [vmem:[%s4516_s7 + $0xc0] sm:$0xff]  ;;  %v762_v21 = vld [vmem:[%s4518_s1 + $0x78] sm:$0xff]  ;;  %v1647_v7 = vld [vmem:[%s4516_s7 + $0xd0] sm:$0xff] }
 0x15c   :  { %2849 = vmatprep.subr.bf16.mxu1 %v3001_v52  ;;  %v3977_v19 = vmul.f32 %v758_v12, %v3875_v57  ;;  %v727_v10 = vadd.f32 %v3555_v1, %v3864_v55  ;;  %v689_v17 = vmul.f32 %v3532_v33, %v3805_v30  ;;  %2894 = vmatprep.subr.bf16.mxu0 %v3001_v52  ;;  %v759_v57 = vld [vmem:[%s4518_s1 + $0x60] sm:$0xff]  ;;  %v1650_v12 = vld [vmem:[%s4516_s7 + $0xe8] sm:$0xff]  ;;  %v1651_v38 = vld [vmem:[%s4516_s7 + $0xf0] sm:$0xff] }
 0x15d   :  { %v3973_v9 = vmul.f32 %v776_v40, %v744_v28  ;;  %2851 = vmatpush1.bf16.msra.mxu1 %v3868_v60  ;;  %v3994_v55 = vmul.f32 %v778_v44, %v746_v41  ;;  %2896 = vmatpush1.bf16.msra.mxu0 %v3866_v53  ;;  %v2856_v30 = vpack.c.bf16 %v1642_v49, %v1641_v16  ;;  %v1648_v40 = vld [vmem:[%s4516_s7 + $0xd8] sm:$0xff]  ;;  %v1649_v45 = vld [vmem:[%s4516_s7 + $0xe0] sm:$0xff] }
 0x15e   :  { %2503 = vmatmul.mubr.msk.f32.gmra.mrb[36].mxu1 %vm387_vm1, %v3888_v54  ;;  %2535 = vmatmul.mubr.msk.f32.gmra.mrb[36].mxu0 %vm387_vm1, %v3888_v54  ;;  %v690_v0 = vmul.f32 %v3532_v33, %v3793_v62  ;;  %v4006_v43 = vmul.f32 %v759_v57, %v727_v10  ;;  %v728_v53 = vadd.f32 %v3555_v1, %v689_v17  ;;  %v1652_v44 = vld [vmem:[%s4516_s7 + $0xf8] sm:$0xff] }
 0x15f   :  { %1041 = vmatprep.mubr.f32.mxu1 %v3000_v50  ;;  %1302 = vmatprep.mubr.f32.mxu0 %v3000_v50  ;;  %v2859_v62 = vpack.c.bf16 %v1644_v11, %v1643_v47  ;;  %v2862_v63 = vpack.c.bf16 %v1646_v42, %v1645_v56  ;;  %v2865_v26 = vpack.c.bf16 %v1648_v40, %v1647_v7 }
 0x160   :  { %2852 = vmatprep.subr.bf16.mxu1 %v3001_v52  ;;  %2897 = vmatprep.subr.bf16.mxu0 %v3001_v52  ;;  %v729_v31 = vadd.f32 %v3555_v1, %v690_v0  ;;  %v4028_v24 = vmul.f32 %v760_v23, %v728_v53  ;;  %v2868_v28 = vpack.c.bf16 %v1650_v12, %v1649_v45 }
 0x161   :  { %2854 = vmatpush1.bf16.msra.mxu1 %v2853_v6  ;;  %2899 = vmatpush1.bf16.msra.mxu0 %v3868_v60  ;;  %v691_v60 = vmul.f32 %v3532_v33, %v3808_v36  ;;  %v2871_v41 = vpack.c.bf16 %v1652_v44, %v1651_v38 }
 0x162   :  { %2504 = vmatmul.mubr.msk.f32.gmra.mrb[38].mxu1 %vm387_vm1, %v3977_v19  ;;  %2536 = vmatmul.mubr.msk.f32.gmra.mrb[38].mxu0 %vm387_vm1, %v3977_v19  ;;  %v4049_v33 = vmul.f32 %v761_v2, %v729_v31 }
 0x163   :  { %1047 = vmatprep.mubr.f32.mxu1 %v3000_v50  ;;  %1308 = vmatprep.mubr.f32.mxu0 %v3000_v50  ;;  %v730_v36 = vadd.f32 %v3555_v1, %v691_v60 }
 0x164   :  { %2855 = vmatprep.subr.bf16.mxu1 %v3001_v52  ;;  %2900 = vmatprep.subr.bf16.mxu0 %v3001_v52 }
 0x165   :  { %2857 = vmatpush1.bf16.msra.mxu1 %v2856_v30  ;;  %2902 = vmatpush1.bf16.msra.mxu0 %v2853_v6  ;;  %v4069_v1 = vmul.f32 %v762_v21, %v730_v36 }
 0x166   :  { %2505 = vmatmul.mubr.msk.f32.gmra.mrb[40].mxu1 %vm387_vm1, %v4006_v43  ;;  %2537 = vmatmul.mubr.msk.f32.gmra.mrb[40].mxu0 %vm387_vm1, %v4006_v43 }
 0x167   :  { %1053 = vmatprep.mubr.f32.mxu1 %v3000_v50  ;;  %1314 = vmatprep.mubr.f32.mxu0 %v3000_v50 }
 0x168   :  { %2858 = vmatprep.subr.bf16.mxu1 %v3001_v52  ;;  %2903 = vmatprep.subr.bf16.mxu0 %v3001_v52 }
 0x169   :  { %2860 = vmatpush1.bf16.msra.mxu1 %v2859_v62  ;;  %2905 = vmatpush1.bf16.msra.mxu0 %v2856_v30  ;;  %v3002_v30 = vmov 1.0  }
 0x16a   :  { %2506 = vmatmul.mubr.msk.f32.gmra.mrb[42].mxu1 %vm387_vm1, %v4028_v24  ;;  %2538 = vmatmul.mubr.msk.f32.gmra.mrb[42].mxu0 %vm387_vm1, %v4028_v24 }
 0x16b   :  { %1059 = vmatprep.mubr.f32.mxu1 %v3000_v50  ;;  %1320 = vmatprep.mubr.f32.mxu0 %v3000_v50 }
 0x16c   :  { %2861 = vmatprep.subr.bf16.mxu1 %v3001_v52  ;;  %2906 = vmatprep.subr.bf16.mxu0 %v3001_v52 }
 0x16d   :  { %2863 = vmatpush1.bf16.msra.mxu1 %v2862_v63  ;;  %2908 = vmatpush1.bf16.msra.mxu0 %v2859_v62 }
 0x16e   :  { %2507 = vmatmul.mubr.msk.f32.gmra.mrb[44].mxu1 %vm387_vm1, %v4049_v33  ;;  %2539 = vmatmul.mubr.msk.f32.gmra.mrb[44].mxu0 %vm387_vm1, %v4049_v33 }
 0x16f   :  { %1065 = vmatprep.mubr.f32.mxu1 %v3000_v50  ;;  %1326 = vmatprep.mubr.f32.mxu0 %v3000_v50 }
 0x170   :  { %2864 = vmatprep.subr.bf16.mxu1 %v3001_v52  ;;  %2909 = vmatprep.subr.bf16.mxu0 %v3001_v52 }
 0x171   :  { %2866 = vmatpush1.bf16.msra.mxu1 %v2865_v26  ;;  %2911 = vmatpush1.bf16.msra.mxu0 %v2862_v63 }
 0x172   :  { %2508 = vmatmul.mubr.msk.f32.gmra.mrb[46].mxu1 %vm387_vm1, %v4069_v1  ;;  %2540 = vmatmul.mubr.msk.f32.gmra.mrb[46].mxu0 %vm387_vm1, %v4069_v1 }
 0x173   :  { %1071 = vmatprep.mubr.f32.mxu1 %v3000_v50  ;;  %1332 = vmatprep.mubr.f32.mxu0 %v3000_v50 }
 0x174   :  { %2867 = vmatprep.subr.bf16.mxu1 %v3001_v52  ;;  %2912 = vmatprep.subr.bf16.mxu0 %v3001_v52 }
 0x175   :  { %2869 = vmatpush1.bf16.msra.mxu1 %v2868_v28  ;;  %2914 = vmatpush1.bf16.msra.mxu0 %v2865_v26 }
 0x176   :  { %2509 = vmatmul.mubr.msk.f32.gmra.mrb[48].mxu1 %vm387_vm1, %v3683_v46  ;;  %2541 = vmatmul.mubr.msk.f32.gmra.mrb[48].mxu0 %vm387_vm1, %v3683_v46 }
 0x177   :  { %1077 = vmatprep.mubr.f32.mxu1 %v3000_v50  ;;  %1338 = vmatprep.mubr.f32.mxu0 %v3000_v50 }
 0x178   :  { %2870 = vmatprep.subr.bf16.mxu1 %v3001_v52  ;;  %2915 = vmatprep.subr.bf16.mxu0 %v3001_v52 }
 0x179   :  { %2872 = vmatpush1.bf16.msra.mxu1 %v2871_v41  ;;  %2917 = vmatpush1.bf16.msra.mxu0 %v2868_v28 }
 0x17a   :  { %2510 = vmatmul.mubr.msk.f32.gmra.mrb[50].mxu1 %vm387_vm1, %v3694_v58  ;;  %2542 = vmatmul.mubr.msk.f32.gmra.mrb[50].mxu0 %vm387_vm1, %v3694_v58 }
 0x17b   :  { %1083 = vmatprep.mubr.f32.mxu1 %v3000_v50  ;;  %1344 = vmatprep.mubr.f32.mxu0 %v3000_v50 }
 0x17c   :  { %2918 = vmatprep.subr.bf16.mxu0 %v3001_v52 }
 0x17d   :  { %2920 = vmatpush1.bf16.msra.mxu0 %v2871_v41 }
 0x17e   :  { %2511 = vmatmul.mubr.msk.f32.gmra.mrb[52].mxu1 %vm387_vm1, %v3696_v3  ;;  %2543 = vmatmul.mubr.msk.f32.gmra.mrb[52].mxu0 %vm387_vm1, %v3696_v3 }
 0x17f   :  { %1089 = vmatprep.mubr.f32.mxu1 %v3000_v50  ;;  %1350 = vmatprep.mubr.f32.mxu0 %v3000_v50 }
 0x182   :  { %2512 = vmatmul.mubr.msk.f32.gmra.mrb[54].mxu1 %vm387_vm1, %v3727_v37  ;;  %2544 = vmatmul.mubr.msk.f32.gmra.mrb[54].mxu0 %vm387_vm1, %v3727_v37 }
 0x183   :  { %1095 = vmatprep.mubr.f32.mxu1 %v3000_v50  ;;  %1356 = vmatprep.mubr.f32.mxu0 %v3000_v50 }
 0x186   :  { %2513 = vmatmul.mubr.msk.f32.gmra.mrb[56].mxu1 %vm387_vm1, %v3734_v51  ;;  %2545 = vmatmul.mubr.msk.f32.gmra.mrb[56].mxu0 %vm387_vm1, %v3734_v51 }
 0x187   :  { %1101 = vmatprep.mubr.f32.mxu1 %v3000_v50  ;;  %1362 = vmatprep.mubr.f32.mxu0 %v3000_v50 }
 0x18a   :  { %2514 = vmatmul.mubr.msk.f32.gmra.mrb[58].mxu1 %vm387_vm1, %v3763_v25  ;;  %2546 = vmatmul.mubr.msk.f32.gmra.mrb[58].mxu0 %vm387_vm1, %v3763_v25 }
 0x18b   :  { %1107 = vmatprep.mubr.f32.mxu1 %v3000_v50  ;;  %1368 = vmatprep.mubr.f32.mxu0 %v3000_v50 }
 0x18e   :  { %2515 = vmatmul.mubr.msk.f32.gmra.mrb[60].mxu1 %vm387_vm1, %v3711_v15  ;;  %2547 = vmatmul.mubr.msk.f32.gmra.mrb[60].mxu0 %vm387_vm1, %v3711_v15 }
 0x18f   :  { %1113 = vmatprep.mubr.f32.mxu1 %v3000_v50  ;;  %1374 = vmatprep.mubr.f32.mxu0 %v3000_v50 }
 0x192   :  { %2516 = vmatmul.mubr.msk.f32.gmra.mrb[62].mxu1 %vm387_vm1, %v3770_v22  ;;  %2548 = vmatmul.mubr.msk.f32.gmra.mrb[62].mxu0 %vm387_vm1, %v3770_v22 }
 0x193   :  { %1119 = vmatprep.mubr.f32.mxu1 %v3000_v50  ;;  %1380 = vmatprep.mubr.f32.mxu0 %v3000_v50 }
 0x196   :  { %2517 = vmatmul.mubr.msk.f32.gmra.mrb[64].mxu1 %vm387_vm1, %v3934_v48  ;;  %2549 = vmatmul.mubr.msk.f32.gmra.mrb[64].mxu0 %vm387_vm1, %v3934_v48 }
 0x197   :  { %1125 = vmatprep.mubr.f32.mxu1 %v3000_v50  ;;  %1386 = vmatprep.mubr.f32.mxu0 %v3000_v50 }
 0x19a   :  { %2518 = vmatmul.mubr.msk.f32.gmra.mrb[66].mxu1 %vm387_vm1, %v3936_v32  ;;  %2550 = vmatmul.mubr.msk.f32.gmra.mrb[66].mxu0 %vm387_vm1, %v3936_v32 }
 0x19b   :  { %1131 = vmatprep.mubr.f32.mxu1 %v3000_v50  ;;  %1392 = vmatprep.mubr.f32.mxu0 %v3000_v50 }
 0x19e   :  { %2519 = vmatmul.mubr.msk.f32.gmra.mrb[68].mxu1 %vm387_vm1, %v3939_v34  ;;  %2551 = vmatmul.mubr.msk.f32.gmra.mrb[68].mxu0 %vm387_vm1, %v3939_v34 }
 0x19f   :  { %1137 = vmatprep.mubr.f32.mxu1 %v3000_v50  ;;  %1398 = vmatprep.mubr.f32.mxu0 %v3000_v50 }
 0x1a2   :  { %2520 = vmatmul.mubr.msk.f32.gmra.mrb[70].mxu1 %vm387_vm1, %v3941_v27  ;;  %2552 = vmatmul.mubr.msk.f32.gmra.mrb[70].mxu0 %vm387_vm1, %v3941_v27 }
 0x1a3   :  { %1143 = vmatprep.mubr.f32.mxu1 %v3000_v50  ;;  %1404 = vmatprep.mubr.f32.mxu0 %v3000_v50 }
 0x1a6   :  { %2521 = vmatmul.mubr.msk.f32.gmra.mrb[72].mxu1 %vm387_vm1, %v3943_v39  ;;  %2553 = vmatmul.mubr.msk.f32.gmra.mrb[72].mxu0 %vm387_vm1, %v3943_v39 }
 0x1a7   :  { %1149 = vmatprep.mubr.f32.mxu1 %v3000_v50  ;;  %1410 = vmatprep.mubr.f32.mxu0 %v3000_v50 }
 0x1aa   :  { %2522 = vmatmul.mubr.msk.f32.gmra.mrb[74].mxu1 %vm387_vm1, %v3973_v9  ;;  %2554 = vmatmul.mubr.msk.f32.gmra.mrb[74].mxu0 %vm387_vm1, %v3973_v9 }
 0x1ab   :  { %1155 = vmatprep.mubr.f32.mxu1 %v3000_v50  ;;  %1416 = vmatprep.mubr.f32.mxu0 %v3000_v50 }
 0x1ae   :  { %2523 = vmatmul.mubr.msk.f32.gmra.mrb[76].mxu1 %vm387_vm1, %v3948_v5  ;;  %2555 = vmatmul.mubr.msk.f32.gmra.mrb[76].mxu0 %vm387_vm1, %v3948_v5 }
 0x1af   :  { %1161 = vmatprep.mubr.f32.mxu1 %v3000_v50  ;;  %1422 = vmatprep.mubr.f32.mxu0 %v3000_v50 }
 0x1b2   :  { %2524 = vmatmul.mubr.msk.f32.gmra.mrb[78].mxu1 %vm387_vm1, %v3994_v55  ;;  %2556 = vmatmul.mubr.msk.f32.gmra.mrb[78].mxu0 %vm387_vm1, %v3994_v55 }
 0x209   :  { %v977_v52 = vpop.f32.mrb[16].mxu1  ;;  %v1238_v6 = vpop.f32.mrb[16].mxu0 }
 0x20a   :  { %vm1429_vm2 = vcmp.ge.f32.partialorder %v1238_v6, 0.0  ;;  %v979_v10 = vpop.f32.mrb[17].mxu1  ;;  %v1240_v17 = vpop.f32.mrb[17].mxu0 }
 0x20b   :  { %v2557_v16 = vsel %vm1429_vm2, 1.0, %v3000_v50  ;;  %vm1430_vm3 = vcmp.ge.f32.partialorder %v1240_v17, 0.0 }
 0x20c   :  { %v1878_v49 = vmul.f32 %v2557_v16, %v977_v52  ;;  %v2558_v57 = vsel %vm1430_vm3, 1.0, %v3000_v50  ;;  %2621 = vmatprep.mubr.msk.f32.mxu1 %vm1430_vm3, %v3002_v30 }
 0x20d   :  { %v1879_v0 = vmul.f32 %v2558_v57, %v979_v10  ;;  %v983_v53 = vpop.f32.mrb[18].mxu1  ;;  %v1244_v47 = vpop.f32.mrb[18].mxu0  ;;  %2622 = vmatmul.mubr.msk.f32.vlgmr.msra.gmra.mrb[80].mxu1 %vm1429_vm2, %v3002_v30 }
 0x20e   :  { %vm1431_vm4 = vcmp.ge.f32.partialorder %v1244_v47, 0.0  ;;  %v985_v11 = vpop.f32.mrb[19].mxu1  ;;  %v1246_v23 = vpop.f32.mrb[19].mxu0 }
 0x20f   :  { %v2559_v62 = vsel %vm1431_vm4, 1.0, %v3000_v50  ;;  %vm1432_vm5 = vcmp.ge.f32.partialorder %v1246_v23, 0.0  ;;  %2006 = vmatprep.mubr.f32.mxu0 %v1879_v0 }
 0x210   :  { %v1880_v31 = vmul.f32 %v2559_v62, %v983_v53  ;;  %v2560_v60 = vsel %vm1432_vm5, 1.0, %v3000_v50  ;;  %2623 = vmatprep.mubr.msk.f32.mxu1 %vm1432_vm5, %v3002_v30  ;;  %2007 = vmatmul.mubr.f32.vlgmr.msra.gmra.mrb[80].mxu0 %v1878_v49 }
 0x211   :  { %v1881_v2 = vmul.f32 %v2560_v60, %v985_v11  ;;  %v989_v56 = vpop.f32.mrb[20].mxu1  ;;  %v1250_v42 = vpop.f32.mrb[20].mxu0  ;;  %2624 = vmatmul.mubr.msk.f32.gmra.mrb[82].mxu1 %vm1431_vm4, %v3002_v30 }
 0x212   :  { %vm1433_vm6 = vcmp.ge.f32.partialorder %v1250_v42, 0.0  ;;  %v991_v36 = vpop.f32.mrb[21].mxu1  ;;  %v1252_v63 = vpop.f32.mrb[21].mxu0 }
 0x213   :  { %v2561_v21 = vsel %vm1433_vm6, 1.0, %v3000_v50  ;;  %vm1434_vm7 = vcmp.ge.f32.partialorder %v1252_v63, 0.0  ;;  %2011 = vmatprep.mubr.f32.mxu0 %v1881_v2 }
 0x214   :  { %v1882_v7 = vmul.f32 %v2561_v21, %v989_v56  ;;  %v2562_v40 = vsel %vm1434_vm7, 1.0, %v3000_v50  ;;  %2625 = vmatprep.mubr.msk.f32.mxu1 %vm1434_vm7, %v3002_v30  ;;  %2012 = vmatmul.mubr.f32.gmra.mrb[82].mxu0 %v1880_v31 }
 0x215   :  { %v1883_v26 = vmul.f32 %v2562_v40, %v991_v36  ;;  %v995_v45 = vpop.f32.mrb[22].mxu1  ;;  %v1256_v12 = vpop.f32.mrb[22].mxu0  ;;  %2626 = vmatmul.mubr.msk.f32.gmra.mrb[84].mxu1 %vm1433_vm6, %v3002_v30 }
 0x216   :  { %vm1435_vm8 = vcmp.ge.f32.partialorder %v1256_v12, 0.0  ;;  %v997_v28 = vpop.f32.mrb[23].mxu1  ;;  %v1258_v38 = vpop.f32.mrb[23].mxu0 }
 0x217   :  { %v2563_v44 = vsel %vm1435_vm8, 1.0, %v3000_v50  ;;  %vm1436_vm9 = vcmp.ge.f32.partialorder %v1258_v38, 0.0  ;;  %2016 = vmatprep.mubr.f32.mxu0 %v1883_v26 }
 0x218   :  { %v1884_v41 = vmul.f32 %v2563_v44, %v995_v45  ;;  %v2564_v52 = vsel %vm1436_vm9, 1.0, %v3000_v50  ;;  %2627 = vmatprep.mubr.msk.f32.mxu1 %vm1436_vm9, %v3002_v30  ;;  %2017 = vmatmul.mubr.f32.gmra.mrb[84].mxu0 %v1882_v7 }
 0x219   :  { %v1885_v6 = vmul.f32 %v2564_v52, %v997_v28  ;;  %v1001_v10 = vpop.f32.mrb[24].mxu1  ;;  %v1262_v17 = vpop.f32.mrb[24].mxu0  ;;  %2628 = vmatmul.mubr.msk.f32.gmra.mrb[86].mxu1 %vm1435_vm8, %v3002_v30 }
 0x21a   :  { %vm1437_vm10 = vcmp.ge.f32.partialorder %v1262_v17, 0.0  ;;  %v1003_v16 = vpop.f32.mrb[25].mxu1  ;;  %v1264_v49 = vpop.f32.mrb[25].mxu0 }
 0x21b   :  { %v2565_v57 = vsel %vm1437_vm10, 1.0, %v3000_v50  ;;  %vm1438_vm11 = vcmp.ge.f32.partialorder %v1264_v49, 0.0  ;;  %2021 = vmatprep.mubr.f32.mxu0 %v1885_v6 }
 0x21c   :  { %v1886_v0 = vmul.f32 %v2565_v57, %v1001_v10  ;;  %v2566_v53 = vsel %vm1438_vm11, 1.0, %v3000_v50  ;;  %2629 = vmatprep.mubr.msk.f32.mxu1 %vm1438_vm11, %v3002_v30  ;;  %2022 = vmatmul.mubr.f32.gmra.mrb[86].mxu0 %v1884_v41 }
 0x21d   :  { %v1887_v47 = vmul.f32 %v2566_v53, %v1003_v16  ;;  %v1007_v11 = vpop.f32.mrb[26].mxu1  ;;  %v1268_v23 = vpop.f32.mrb[26].mxu0  ;;  %2630 = vmatmul.mubr.msk.f32.gmra.mrb[88].mxu1 %vm1437_vm10, %v3002_v30 }
 0x21e   :  { %vm1439_vm12 = vcmp.ge.f32.partialorder %v1268_v23, 0.0  ;;  %v1009_v62 = vpop.f32.mrb[27].mxu1  ;;  %v1270_v31 = vpop.f32.mrb[27].mxu0 }
 0x21f   :  { %v2567_v60 = vsel %vm1439_vm12, 1.0, %v3000_v50  ;;  %vm1440_vm13 = vcmp.ge.f32.partialorder %v1270_v31, 0.0  ;;  %2026 = vmatprep.mubr.f32.mxu0 %v1887_v47 }
 0x220   :  { %v1888_v2 = vmul.f32 %v2567_v60, %v1007_v11  ;;  %v2568_v56 = vsel %vm1440_vm13, 1.0, %v3000_v50  ;;  %2631 = vmatprep.mubr.msk.f32.mxu1 %vm1440_vm13, %v3002_v30  ;;  %2027 = vmatmul.mubr.f32.gmra.mrb[88].mxu0 %v1886_v0 }
 0x221   :  { %v1889_v42 = vmul.f32 %v2568_v56, %v1009_v62  ;;  %v1013_v36 = vpop.f32.mrb[28].mxu1  ;;  %v1274_v63 = vpop.f32.mrb[28].mxu0  ;;  %2632 = vmatmul.mubr.msk.f32.gmra.mrb[90].mxu1 %vm1439_vm12, %v3002_v30 }
 0x222   :  { %vm1441_vm14 = vcmp.ge.f32.partialorder %v1274_v63, 0.0  ;;  %v1015_v21 = vpop.f32.mrb[29].mxu1  ;;  %v1276_v7 = vpop.f32.mrb[29].mxu0 }
 0x223   :  { %v2569_v40 = vsel %vm1441_vm14, 1.0, %v3000_v50  ;;  %vm1442_vm15 = vcmp.ge.f32.partialorder %v1276_v7, 0.0  ;;  %2031 = vmatprep.mubr.f32.mxu0 %v1889_v42 }
 0x224   :  { %v1890_v26 = vmul.f32 %v2569_v40, %v1013_v36  ;;  %v2570_v45 = vsel %vm1442_vm15, 1.0, %v3000_v50  ;;  %2633 = vmatprep.mubr.msk.f32.mxu1 %vm1442_vm15, %v3002_v30  ;;  %2032 = vmatmul.mubr.f32.gmra.mrb[90].mxu0 %v1888_v2 }
 0x225   :  { %v1891_v12 = vmul.f32 %v2570_v45, %v1015_v21  ;;  %v1019_v28 = vpop.f32.mrb[30].mxu1  ;;  %v1280_v38 = vpop.f32.mrb[30].mxu0  ;;  %2634 = vmatmul.mubr.msk.f32.gmra.mrb[92].mxu1 %vm1441_vm14, %v3002_v30 }
 0x226   :  { %vm1443_vm0 = vcmp.ge.f32.partialorder %v1280_v38, 0.0  ;;  %v1021_v44 = vpop.f32.mrb[31].mxu1  ;;  %v1282_v41 = vpop.f32.mrb[31].mxu0 }
 0x227   :  { %v2571_v52 = vsel %vm1443_vm0, 1.0, %v3000_v50  ;;  %vm1444_vm2 = vcmp.ge.f32.partialorder %v1282_v41, 0.0  ;;  %2036 = vmatprep.mubr.f32.mxu0 %v1891_v12 }
 0x228   :  { %v1892_v6 = vmul.f32 %v2571_v52, %v1019_v28  ;;  %v2572_v10 = vsel %vm1444_vm2, 1.0, %v3000_v50  ;;  %2635 = vmatprep.mubr.msk.f32.mxu1 %vm1444_vm2, %v3002_v30  ;;  %2037 = vmatmul.mubr.f32.gmra.mrb[92].mxu0 %v1890_v26 }
 0x229   :  { %v1893_v17 = vmul.f32 %v2572_v10, %v1021_v44  ;;  %v1025_v16 = vpop.f32.mrb[32].mxu1  ;;  %v1286_v49 = vpop.f32.mrb[32].mxu0  ;;  %2636 = vmatmul.mubr.msk.f32.gmra.mrb[94].mxu1 %vm1443_vm0, %v3002_v30 }
 0x22a   :  { %vm1445_vm3 = vcmp.ge.f32.partialorder %v1286_v49, 0.0  ;;  %v1027_v57 = vpop.f32.mrb[33].mxu1  ;;  %v1288_v0 = vpop.f32.mrb[33].mxu0 }
 0x22b   :  { %v2573_v53 = vsel %vm1445_vm3, 1.0, %v3000_v50  ;;  %vm1446_vm4 = vcmp.ge.f32.partialorder %v1288_v0, 0.0  ;;  %2041 = vmatprep.mubr.f32.mxu0 %v1893_v17 }
 0x22c   :  { %v1894_v47 = vmul.f32 %v2573_v53, %v1025_v16  ;;  %v2574_v11 = vsel %vm1446_vm4, 1.0, %v3000_v50  ;;  %2637 = vmatprep.mubr.msk.f32.mxu1 %vm1446_vm4, %v3002_v30  ;;  %2042 = vmatmul.mubr.f32.gmra.mrb[94].mxu0 %v1892_v6 }
 0x22d   :  { %v1895_v23 = vmul.f32 %v2574_v11, %v1027_v57  ;;  %v1031_v62 = vpop.f32.mrb[34].mxu1  ;;  %v1292_v31 = vpop.f32.mrb[34].mxu0  ;;  %2638 = vmatmul.mubr.msk.f32.gmra.mrb[96].mxu1 %vm1445_vm3, %v3002_v30 }
 0x22e   :  { %vm1447_vm5 = vcmp.ge.f32.partialorder %v1292_v31, 0.0  ;;  %v1033_v60 = vpop.f32.mrb[35].mxu1  ;;  %v1294_v2 = vpop.f32.mrb[35].mxu0 }
 0x22f   :  { %v2575_v56 = vsel %vm1447_vm5, 1.0, %v3000_v50  ;;  %vm1448_vm6 = vcmp.ge.f32.partialorder %v1294_v2, 0.0  ;;  %2046 = vmatprep.mubr.f32.mxu0 %v1895_v23 }
 0x230   :  { %v1896_v42 = vmul.f32 %v2575_v56, %v1031_v62  ;;  %v2576_v36 = vsel %vm1448_vm6, 1.0, %v3000_v50  ;;  %2639 = vmatprep.mubr.msk.f32.mxu1 %vm1448_vm6, %v3002_v30  ;;  %2047 = vmatmul.mubr.f32.gmra.mrb[96].mxu0 %v1894_v47 }
 0x231   :  { %v1897_v63 = vmul.f32 %v2576_v36, %v1033_v60  ;;  %v1037_v21 = vpop.f32.mrb[36].mxu1  ;;  %v1298_v7 = vpop.f32.mrb[36].mxu0  ;;  %2640 = vmatmul.mubr.msk.f32.gmra.mrb[98].mxu1 %vm1447_vm5, %v3002_v30 }
 0x232   :  { %vm1449_vm7 = vcmp.ge.f32.partialorder %v1298_v7, 0.0  ;;  %v1039_v40 = vpop.f32.mrb[37].mxu1  ;;  %v1300_v26 = vpop.f32.mrb[37].mxu0 }
 0x233   :  { %v2577_v45 = vsel %vm1449_vm7, 1.0, %v3000_v50  ;;  %vm1450_vm8 = vcmp.ge.f32.partialorder %v1300_v26, 0.0  ;;  %2051 = vmatprep.mubr.f32.mxu0 %v1897_v63 }
 0x234   :  { %v1898_v12 = vmul.f32 %v2577_v45, %v1037_v21  ;;  %v2578_v28 = vsel %vm1450_vm8, 1.0, %v3000_v50  ;;  %2641 = vmatprep.mubr.msk.f32.mxu1 %vm1450_vm8, %v3002_v30  ;;  %2052 = vmatmul.mubr.f32.gmra.mrb[98].mxu0 %v1896_v42 }
 0x235   :  { %v1899_v38 = vmul.f32 %v2578_v28, %v1039_v40  ;;  %v1043_v44 = vpop.f32.mrb[38].mxu1  ;;  %v1304_v41 = vpop.f32.mrb[38].mxu0  ;;  %2642 = vmatmul.mubr.msk.f32.gmra.mrb[100].mxu1 %vm1449_vm7, %v3002_v30 }
 0x236   :  { %vm1451_vm9 = vcmp.ge.f32.partialorder %v1304_v41, 0.0  ;;  %v1045_v52 = vpop.f32.mrb[39].mxu1  ;;  %v1306_v6 = vpop.f32.mrb[39].mxu0 }
 0x237   :  { %v2579_v10 = vsel %vm1451_vm9, 1.0, %v3000_v50  ;;  %vm1452_vm10 = vcmp.ge.f32.partialorder %v1306_v6, 0.0  ;;  %2056 = vmatprep.mubr.f32.mxu0 %v1899_v38 }
 0x238   :  { %v1900_v17 = vmul.f32 %v2579_v10, %v1043_v44  ;;  %v2580_v16 = vsel %vm1452_vm10, 1.0, %v3000_v50  ;;  %2643 = vmatprep.mubr.msk.f32.mxu1 %vm1452_vm10, %v3002_v30  ;;  %2057 = vmatmul.mubr.f32.gmra.mrb[100].mxu0 %v1898_v12 }
 0x239   :  { %v1901_v49 = vmul.f32 %v2580_v16, %v1045_v52  ;;  %v1049_v57 = vpop.f32.mrb[40].mxu1  ;;  %v1310_v0 = vpop.f32.mrb[40].mxu0  ;;  %2644 = vmatmul.mubr.msk.f32.gmra.mrb[102].mxu1 %vm1451_vm9, %v3002_v30 }
 0x23a   :  { %vm1453_vm11 = vcmp.ge.f32.partialorder %v1310_v0, 0.0  ;;  %v1051_v53 = vpop.f32.mrb[41].mxu1  ;;  %v1312_v47 = vpop.f32.mrb[41].mxu0 }
 0x23b   :  { %v2581_v11 = vsel %vm1453_vm11, 1.0, %v3000_v50  ;;  %vm1454_vm12 = vcmp.ge.f32.partialorder %v1312_v47, 0.0  ;;  %2061 = vmatprep.mubr.f32.mxu0 %v1901_v49 }
 0x23c   :  { %v1902_v23 = vmul.f32 %v2581_v11, %v1049_v57  ;;  %v2582_v62 = vsel %vm1454_vm12, 1.0, %v3000_v50  ;;  %2645 = vmatprep.mubr.msk.f32.mxu1 %vm1454_vm12, %v3002_v30  ;;  %2062 = vmatmul.mubr.f32.gmra.mrb[102].mxu0 %v1900_v17 }
 0x23d   :  { %v1903_v31 = vmul.f32 %v2582_v62, %v1051_v53  ;;  %v1055_v60 = vpop.f32.mrb[42].mxu1  ;;  %v1316_v2 = vpop.f32.mrb[42].mxu0  ;;  %2646 = vmatmul.mubr.msk.f32.gmra.mrb[104].mxu1 %vm1453_vm11, %v3002_v30 }
 0x23e   :  { %vm1455_vm13 = vcmp.ge.f32.partialorder %v1316_v2, 0.0  ;;  %v1057_v56 = vpop.f32.mrb[43].mxu1  ;;  %v1318_v42 = vpop.f32.mrb[43].mxu0 }
 0x23f   :  { %v2583_v36 = vsel %vm1455_vm13, 1.0, %v3000_v50  ;;  %vm1456_vm14 = vcmp.ge.f32.partialorder %v1318_v42, 0.0  ;;  %2066 = vmatprep.mubr.f32.mxu0 %v1903_v31 }
 0x240   :  { %v1904_v63 = vmul.f32 %v2583_v36, %v1055_v60  ;;  %v2584_v21 = vsel %vm1456_vm14, 1.0, %v3000_v50  ;;  %2647 = vmatprep.mubr.msk.f32.mxu1 %vm1456_vm14, %v3002_v30  ;;  %2067 = vmatmul.mubr.f32.gmra.mrb[104].mxu0 %v1902_v23 }
 0x241   :  { %v1905_v7 = vmul.f32 %v2584_v21, %v1057_v56  ;;  %v1061_v40 = vpop.f32.mrb[44].mxu1  ;;  %v1322_v26 = vpop.f32.mrb[44].mxu0  ;;  %2648 = vmatmul.mubr.msk.f32.gmra.mrb[106].mxu1 %vm1455_vm13, %v3002_v30 }
 0x242   :  { %vm1457_vm15 = vcmp.ge.f32.partialorder %v1322_v26, 0.0  ;;  %v1063_v45 = vpop.f32.mrb[45].mxu1  ;;  %v1324_v12 = vpop.f32.mrb[45].mxu0 }
 0x243   :  { %v2585_v28 = vsel %vm1457_vm15, 1.0, %v3000_v50  ;;  %vm1458_vm0 = vcmp.ge.f32.partialorder %v1324_v12, 0.0  ;;  %2071 = vmatprep.mubr.f32.mxu0 %v1905_v7 }
 0x244   :  { %v1906_v38 = vmul.f32 %v2585_v28, %v1061_v40  ;;  %v2586_v44 = vsel %vm1458_vm0, 1.0, %v3000_v50  ;;  %2649 = vmatprep.mubr.msk.f32.mxu1 %vm1458_vm0, %v3002_v30  ;;  %2072 = vmatmul.mubr.f32.gmra.mrb[106].mxu0 %v1904_v63 }
 0x245   :  { %v1907_v41 = vmul.f32 %v2586_v44, %v1063_v45  ;;  %v1067_v52 = vpop.f32.mrb[46].mxu1  ;;  %v1328_v6 = vpop.f32.mrb[46].mxu0  ;;  %2650 = vmatmul.mubr.msk.f32.gmra.mrb[108].mxu1 %vm1457_vm15, %v3002_v30 }
 0x246   :  { %vm1459_vm2 = vcmp.ge.f32.partialorder %v1328_v6, 0.0  ;;  %v1069_v10 = vpop.f32.mrb[47].mxu1  ;;  %v1330_v17 = vpop.f32.mrb[47].mxu0 }
 0x247   :  { %v2587_v16 = vsel %vm1459_vm2, 1.0, %v3000_v50  ;;  %vm1460_vm3 = vcmp.ge.f32.partialorder %v1330_v17, 0.0  ;;  %2076 = vmatprep.mubr.f32.mxu0 %v1907_v41 }
 0x248   :  { %v1908_v49 = vmul.f32 %v2587_v16, %v1067_v52  ;;  %v2588_v57 = vsel %vm1460_vm3, 1.0, %v3000_v50  ;;  %2651 = vmatprep.mubr.msk.f32.mxu1 %vm1460_vm3, %v3002_v30  ;;  %2077 = vmatmul.mubr.f32.gmra.mrb[108].mxu0 %v1906_v38 }
 0x249   :  { %v1909_v0 = vmul.f32 %v2588_v57, %v1069_v10  ;;  %v1073_v53 = vpop.f32.mrb[48].mxu1  ;;  %v1334_v47 = vpop.f32.mrb[48].mxu0  ;;  %2652 = vmatmul.mubr.msk.f32.gmra.mrb[110].mxu1 %vm1459_vm2, %v3002_v30 }
 0x24a   :  { %vm1461_vm4 = vcmp.ge.f32.partialorder %v1334_v47, 0.0  ;;  %v1075_v11 = vpop.f32.mrb[49].mxu1  ;;  %v1336_v23 = vpop.f32.mrb[49].mxu0 }
 0x24b   :  { %v2589_v62 = vsel %vm1461_vm4, 1.0, %v3000_v50  ;;  %vm1462_vm5 = vcmp.ge.f32.partialorder %v1336_v23, 0.0  ;;  %2081 = vmatprep.mubr.f32.mxu0 %v1909_v0 }
 0x24c   :  { %v1910_v31 = vmul.f32 %v2589_v62, %v1073_v53  ;;  %v2590_v60 = vsel %vm1462_vm5, 1.0, %v3000_v50  ;;  %2653 = vmatprep.mubr.msk.f32.mxu1 %vm1462_vm5, %v3002_v30  ;;  %2082 = vmatmul.mubr.f32.gmra.mrb[110].mxu0 %v1908_v49 }
 0x24d   :  { %v1911_v2 = vmul.f32 %v2590_v60, %v1075_v11  ;;  %v1079_v56 = vpop.f32.mrb[50].mxu1  ;;  %v1340_v42 = vpop.f32.mrb[50].mxu0  ;;  %2654 = vmatmul.mubr.msk.f32.gmra.mrb[112].mxu1 %vm1461_vm4, %v3002_v30 }
 0x24e   :  { %vm1463_vm6 = vcmp.ge.f32.partialorder %v1340_v42, 0.0  ;;  %v1081_v36 = vpop.f32.mrb[51].mxu1  ;;  %v1342_v63 = vpop.f32.mrb[51].mxu0 }
 0x24f   :  { %v2591_v21 = vsel %vm1463_vm6, 1.0, %v3000_v50  ;;  %vm1464_vm7 = vcmp.ge.f32.partialorder %v1342_v63, 0.0  ;;  %2086 = vmatprep.mubr.f32.mxu0 %v1911_v2 }
 0x250   :  { %v1912_v7 = vmul.f32 %v2591_v21, %v1079_v56  ;;  %v2592_v40 = vsel %vm1464_vm7, 1.0, %v3000_v50  ;;  %2655 = vmatprep.mubr.msk.f32.mxu1 %vm1464_vm7, %v3002_v30  ;;  %2087 = vmatmul.mubr.f32.gmra.mrb[112].mxu0 %v1910_v31 }
 0x251   :  { %v1913_v26 = vmul.f32 %v2592_v40, %v1081_v36  ;;  %v1085_v45 = vpop.f32.mrb[52].mxu1  ;;  %v1346_v12 = vpop.f32.mrb[52].mxu0  ;;  %2656 = vmatmul.mubr.msk.f32.gmra.mrb[114].mxu1 %vm1463_vm6, %v3002_v30 }
 0x252   :  { %vm1465_vm8 = vcmp.ge.f32.partialorder %v1346_v12, 0.0  ;;  %v1087_v28 = vpop.f32.mrb[53].mxu1  ;;  %v1348_v38 = vpop.f32.mrb[53].mxu0 }
 0x253   :  { %v2593_v44 = vsel %vm1465_vm8, 1.0, %v3000_v50  ;;  %vm1466_vm9 = vcmp.ge.f32.partialorder %v1348_v38, 0.0  ;;  %2091 = vmatprep.mubr.f32.mxu0 %v1913_v26 }
 0x254   :  { %v1914_v41 = vmul.f32 %v2593_v44, %v1085_v45  ;;  %v2594_v52 = vsel %vm1466_vm9, 1.0, %v3000_v50  ;;  %2657 = vmatprep.mubr.msk.f32.mxu1 %vm1466_vm9, %v3002_v30  ;;  %2092 = vmatmul.mubr.f32.gmra.mrb[114].mxu0 %v1912_v7 }
 0x255   :  { %v1915_v6 = vmul.f32 %v2594_v52, %v1087_v28  ;;  %v1091_v10 = vpop.f32.mrb[54].mxu1  ;;  %v1352_v17 = vpop.f32.mrb[54].mxu0  ;;  %2658 = vmatmul.mubr.msk.f32.gmra.mrb[116].mxu1 %vm1465_vm8, %v3002_v30 }
 0x256   :  { %vm1467_vm10 = vcmp.ge.f32.partialorder %v1352_v17, 0.0  ;;  %v1093_v16 = vpop.f32.mrb[55].mxu1  ;;  %v1354_v49 = vpop.f32.mrb[55].mxu0 }
 0x257   :  { %v2595_v57 = vsel %vm1467_vm10, 1.0, %v3000_v50  ;;  %vm1468_vm11 = vcmp.ge.f32.partialorder %v1354_v49, 0.0  ;;  %2096 = vmatprep.mubr.f32.mxu0 %v1915_v6 }
 0x258   :  { %v1916_v0 = vmul.f32 %v2595_v57, %v1091_v10  ;;  %v2596_v53 = vsel %vm1468_vm11, 1.0, %v3000_v50  ;;  %2659 = vmatprep.mubr.msk.f32.mxu1 %vm1468_vm11, %v3002_v30  ;;  %2097 = vmatmul.mubr.f32.gmra.mrb[116].mxu0 %v1914_v41 }
 0x259   :  { %v1917_v47 = vmul.f32 %v2596_v53, %v1093_v16  ;;  %v1097_v11 = vpop.f32.mrb[56].mxu1  ;;  %v1358_v23 = vpop.f32.mrb[56].mxu0  ;;  %2660 = vmatmul.mubr.msk.f32.gmra.mrb[118].mxu1 %vm1467_vm10, %v3002_v30 }
 0x25a   :  { %vm1469_vm12 = vcmp.ge.f32.partialorder %v1358_v23, 0.0  ;;  %v1099_v62 = vpop.f32.mrb[57].mxu1  ;;  %v1360_v31 = vpop.f32.mrb[57].mxu0 }
 0x25b   :  { %v2597_v60 = vsel %vm1469_vm12, 1.0, %v3000_v50  ;;  %vm1470_vm13 = vcmp.ge.f32.partialorder %v1360_v31, 0.0  ;;  %2101 = vmatprep.mubr.f32.mxu0 %v1917_v47 }
 0x25c   :  { %v1918_v2 = vmul.f32 %v2597_v60, %v1097_v11  ;;  %v2598_v56 = vsel %vm1470_vm13, 1.0, %v3000_v50  ;;  %2661 = vmatprep.mubr.msk.f32.mxu1 %vm1470_vm13, %v3002_v30  ;;  %2102 = vmatmul.mubr.f32.gmra.mrb[118].mxu0 %v1916_v0 }
 0x25d   :  { %v1919_v42 = vmul.f32 %v2598_v56, %v1099_v62  ;;  %v1103_v36 = vpop.f32.mrb[58].mxu1  ;;  %v1364_v63 = vpop.f32.mrb[58].mxu0  ;;  %2662 = vmatmul.mubr.msk.f32.gmra.mrb[120].mxu1 %vm1469_vm12, %v3002_v30 }
 0x25e   :  { %vm1471_vm14 = vcmp.ge.f32.partialorder %v1364_v63, 0.0  ;;  %v1105_v21 = vpop.f32.mrb[59].mxu1  ;;  %v1366_v7 = vpop.f32.mrb[59].mxu0 }
 0x25f   :  { %v2599_v40 = vsel %vm1471_vm14, 1.0, %v3000_v50  ;;  %vm1472_vm15 = vcmp.ge.f32.partialorder %v1366_v7, 0.0  ;;  %2106 = vmatprep.mubr.f32.mxu0 %v1919_v42 }
 0x260   :  { %v1920_v26 = vmul.f32 %v2599_v40, %v1103_v36  ;;  %v2600_v45 = vsel %vm1472_vm15, 1.0, %v3000_v50  ;;  %2663 = vmatprep.mubr.msk.f32.mxu1 %vm1472_vm15, %v3002_v30  ;;  %2107 = vmatmul.mubr.f32.gmra.mrb[120].mxu0 %v1918_v2 }
 0x261   :  { %v1921_v12 = vmul.f32 %v2600_v45, %v1105_v21  ;;  %v1109_v28 = vpop.f32.mrb[60].mxu1  ;;  %v1370_v38 = vpop.f32.mrb[60].mxu0  ;;  %2664 = vmatmul.mubr.msk.f32.gmra.mrb[122].mxu1 %vm1471_vm14, %v3002_v30 }
 0x262   :  { %vm1473_vm0 = vcmp.ge.f32.partialorder %v1370_v38, 0.0  ;;  %v1111_v44 = vpop.f32.mrb[61].mxu1  ;;  %v1372_v41 = vpop.f32.mrb[61].mxu0 }
 0x263   :  { %v2601_v52 = vsel %vm1473_vm0, 1.0, %v3000_v50  ;;  %vm1474_vm2 = vcmp.ge.f32.partialorder %v1372_v41, 0.0  ;;  %2111 = vmatprep.mubr.f32.mxu0 %v1921_v12 }
 0x264   :  { %v1922_v6 = vmul.f32 %v2601_v52, %v1109_v28  ;;  %v2602_v10 = vsel %vm1474_vm2, 1.0, %v3000_v50  ;;  %2665 = vmatprep.mubr.msk.f32.mxu1 %vm1474_vm2, %v3002_v30  ;;  %2112 = vmatmul.mubr.f32.gmra.mrb[122].mxu0 %v1920_v26 }
 0x265   :  { %v1923_v17 = vmul.f32 %v2602_v10, %v1111_v44  ;;  %v1115_v16 = vpop.f32.mrb[62].mxu1  ;;  %v1376_v49 = vpop.f32.mrb[62].mxu0  ;;  %2666 = vmatmul.mubr.msk.f32.gmra.mrb[124].mxu1 %vm1473_vm0, %v3002_v30 }
 0x266   :  { %vm1475_vm3 = vcmp.ge.f32.partialorder %v1376_v49, 0.0  ;;  %v1117_v57 = vpop.f32.mrb[63].mxu1  ;;  %v1378_v0 = vpop.f32.mrb[63].mxu0 }
 0x267   :  { %v2603_v53 = vsel %vm1475_vm3, 1.0, %v3000_v50  ;;  %vm1476_vm4 = vcmp.ge.f32.partialorder %v1378_v0, 0.0  ;;  %2116 = vmatprep.mubr.f32.mxu0 %v1923_v17 }
 0x268   :  { %v1924_v47 = vmul.f32 %v2603_v53, %v1115_v16  ;;  %v2604_v11 = vsel %vm1476_vm4, 1.0, %v3000_v50  ;;  %2667 = vmatprep.mubr.msk.f32.mxu1 %vm1476_vm4, %v3002_v30  ;;  %2117 = vmatmul.mubr.f32.gmra.mrb[124].mxu0 %v1922_v6 }
 0x269   :  { %v1925_v23 = vmul.f32 %v2604_v11, %v1117_v57  ;;  %v1121_v62 = vpop.f32.mrb[64].mxu1  ;;  %v1382_v31 = vpop.f32.mrb[64].mxu0  ;;  %2668 = vmatmul.mubr.msk.f32.gmra.mrb[126].mxu1 %vm1475_vm3, %v3002_v30 }
 0x26a   :  { %vm1477_vm5 = vcmp.ge.f32.partialorder %v1382_v31, 0.0  ;;  %v1123_v60 = vpop.f32.mrb[65].mxu1  ;;  %v1384_v2 = vpop.f32.mrb[65].mxu0 }
 0x26b   :  { %v2605_v56 = vsel %vm1477_vm5, 1.0, %v3000_v50  ;;  %vm1478_vm6 = vcmp.ge.f32.partialorder %v1384_v2, 0.0  ;;  %2121 = vmatprep.mubr.f32.mxu0 %v1925_v23 }
 0x26c   :  { %v1926_v42 = vmul.f32 %v2605_v56, %v1121_v62  ;;  %v2606_v36 = vsel %vm1478_vm6, 1.0, %v3000_v50  ;;  %2669 = vmatprep.mubr.msk.f32.mxu1 %vm1478_vm6, %v3002_v30  ;;  %2122 = vmatmul.mubr.f32.gmra.mrb[126].mxu0 %v1924_v47 }
 0x26d   :  { %v1927_v63 = vmul.f32 %v2606_v36, %v1123_v60  ;;  %v1127_v21 = vpop.f32.mrb[66].mxu1  ;;  %v1388_v7 = vpop.f32.mrb[66].mxu0  ;;  %2670 = vmatmul.mubr.msk.f32.gmra.mrb[128].mxu1 %vm1477_vm5, %v3002_v30 }
 0x26e   :  { %vm1479_vm7 = vcmp.ge.f32.partialorder %v1388_v7, 0.0  ;;  %v1129_v40 = vpop.f32.mrb[67].mxu1  ;;  %v1390_v26 = vpop.f32.mrb[67].mxu0 }
 0x26f   :  { %v2607_v45 = vsel %vm1479_vm7, 1.0, %v3000_v50  ;;  %vm1480_vm8 = vcmp.ge.f32.partialorder %v1390_v26, 0.0  ;;  %2126 = vmatprep.mubr.f32.mxu0 %v1927_v63 }
 0x270   :  { %v1928_v12 = vmul.f32 %v2607_v45, %v1127_v21  ;;  %v2608_v28 = vsel %vm1480_vm8, 1.0, %v3000_v50  ;;  %2671 = vmatprep.mubr.msk.f32.mxu1 %vm1480_vm8, %v3002_v30  ;;  %2127 = vmatmul.mubr.f32.gmra.mrb[128].mxu0 %v1926_v42 }
 0x271   :  { %v1929_v38 = vmul.f32 %v2608_v28, %v1129_v40  ;;  %v1133_v44 = vpop.f32.mrb[68].mxu1  ;;  %v1394_v41 = vpop.f32.mrb[68].mxu0  ;;  %2672 = vmatmul.mubr.msk.f32.gmra.mrb[130].mxu1 %vm1479_vm7, %v3002_v30 }
 0x272   :  { %vm1481_vm9 = vcmp.ge.f32.partialorder %v1394_v41, 0.0  ;;  %v1135_v52 = vpop.f32.mrb[69].mxu1  ;;  %v1396_v6 = vpop.f32.mrb[69].mxu0 }
 0x273   :  { %v2609_v10 = vsel %vm1481_vm9, 1.0, %v3000_v50  ;;  %vm1482_vm10 = vcmp.ge.f32.partialorder %v1396_v6, 0.0  ;;  %2131 = vmatprep.mubr.f32.mxu0 %v1929_v38 }
 0x274   :  { %v1930_v17 = vmul.f32 %v2609_v10, %v1133_v44  ;;  %v2610_v16 = vsel %vm1482_vm10, 1.0, %v3000_v50  ;;  %2673 = vmatprep.mubr.msk.f32.mxu1 %vm1482_vm10, %v3002_v30  ;;  %2132 = vmatmul.mubr.f32.gmra.mrb[130].mxu0 %v1928_v12 }
 0x275   :  { %v1931_v49 = vmul.f32 %v2610_v16, %v1135_v52  ;;  %v1139_v57 = vpop.f32.mrb[70].mxu1  ;;  %v1400_v0 = vpop.f32.mrb[70].mxu0  ;;  %2674 = vmatmul.mubr.msk.f32.gmra.mrb[132].mxu1 %vm1481_vm9, %v3002_v30 }
 0x276   :  { %vm1483_vm11 = vcmp.ge.f32.partialorder %v1400_v0, 0.0  ;;  %v1141_v53 = vpop.f32.mrb[71].mxu1  ;;  %v1402_v47 = vpop.f32.mrb[71].mxu0 }
 0x277   :  { %v2611_v11 = vsel %vm1483_vm11, 1.0, %v3000_v50  ;;  %vm1484_vm12 = vcmp.ge.f32.partialorder %v1402_v47, 0.0  ;;  %2136 = vmatprep.mubr.f32.mxu0 %v1931_v49 }
 0x278   :  { %v1932_v23 = vmul.f32 %v2611_v11, %v1139_v57  ;;  %v2612_v62 = vsel %vm1484_vm12, 1.0, %v3000_v50  ;;  %2675 = vmatprep.mubr.msk.f32.mxu1 %vm1484_vm12, %v3002_v30  ;;  %2137 = vmatmul.mubr.f32.gmra.mrb[132].mxu0 %v1930_v17 }
 0x279   :  { %v1933_v31 = vmul.f32 %v2612_v62, %v1141_v53  ;;  %v1145_v60 = vpop.f32.mrb[72].mxu1  ;;  %v1406_v2 = vpop.f32.mrb[72].mxu0  ;;  %2676 = vmatmul.mubr.msk.f32.gmra.mrb[134].mxu1 %vm1483_vm11, %v3002_v30 }
 0x27a   :  { %vm1485_vm13 = vcmp.ge.f32.partialorder %v1406_v2, 0.0  ;;  %v1147_v56 = vpop.f32.mrb[73].mxu1  ;;  %v1408_v42 = vpop.f32.mrb[73].mxu0 }
 0x27b   :  { %v2613_v36 = vsel %vm1485_vm13, 1.0, %v3000_v50  ;;  %vm1486_vm14 = vcmp.ge.f32.partialorder %v1408_v42, 0.0  ;;  %2141 = vmatprep.mubr.f32.mxu0 %v1933_v31 }
 0x27c   :  { %v1934_v63 = vmul.f32 %v2613_v36, %v1145_v60  ;;  %v2614_v21 = vsel %vm1486_vm14, 1.0, %v3000_v50  ;;  %2677 = vmatprep.mubr.msk.f32.mxu1 %vm1486_vm14, %v3002_v30  ;;  %2142 = vmatmul.mubr.f32.gmra.mrb[134].mxu0 %v1932_v23 }
 0x27d   :  { %v1935_v7 = vmul.f32 %v2614_v21, %v1147_v56  ;;  %v1151_v40 = vpop.f32.mrb[74].mxu1  ;;  %v1412_v26 = vpop.f32.mrb[74].mxu0  ;;  %2678 = vmatmul.mubr.msk.f32.gmra.mrb[136].mxu1 %vm1485_vm13, %v3002_v30 }
 0x27e   :  { %vm1487_vm15 = vcmp.ge.f32.partialorder %v1412_v26, 0.0  ;;  %v1153_v45 = vpop.f32.mrb[75].mxu1  ;;  %v1414_v12 = vpop.f32.mrb[75].mxu0 }
 0x27f   :  { %v2615_v28 = vsel %vm1487_vm15, 1.0, %v3000_v50  ;;  %vm1488_vm0 = vcmp.ge.f32.partialorder %v1414_v12, 0.0  ;;  %2146 = vmatprep.mubr.f32.mxu0 %v1935_v7 }
 0x280   :  { %v1936_v38 = vmul.f32 %v2615_v28, %v1151_v40  ;;  %v2616_v44 = vsel %vm1488_vm0, 1.0, %v3000_v50  ;;  %2679 = vmatprep.mubr.msk.f32.mxu1 %vm1488_vm0, %v3002_v30  ;;  %2147 = vmatmul.mubr.f32.gmra.mrb[136].mxu0 %v1934_v63 }
 0x281   :  { %v1937_v41 = vmul.f32 %v2616_v44, %v1153_v45  ;;  %v1157_v52 = vpop.f32.mrb[76].mxu1  ;;  %v1418_v6 = vpop.f32.mrb[76].mxu0  ;;  %2680 = vmatmul.mubr.msk.f32.gmra.mrb[138].mxu1 %vm1487_vm15, %v3002_v30 }
 0x282   :  { %vm1489_vm2 = vcmp.ge.f32.partialorder %v1418_v6, 0.0  ;;  %v1159_v10 = vpop.f32.mrb[77].mxu1  ;;  %v1420_v17 = vpop.f32.mrb[77].mxu0 }
 0x283   :  { %v2617_v16 = vsel %vm1489_vm2, 1.0, %v3000_v50  ;;  %vm1490_vm3 = vcmp.ge.f32.partialorder %v1420_v17, 0.0  ;;  %2151 = vmatprep.mubr.f32.mxu0 %v1937_v41 }
 0x284   :  { %v1938_v49 = vmul.f32 %v2617_v16, %v1157_v52  ;;  %v2618_v57 = vsel %vm1490_vm3, 1.0, %v3000_v50  ;;  %2681 = vmatprep.mubr.msk.f32.mxu1 %vm1490_vm3, %v3002_v30  ;;  %2152 = vmatmul.mubr.f32.gmra.mrb[138].mxu0 %v1936_v38 }
 0x285   :  { %v1939_v0 = vmul.f32 %v2618_v57, %v1159_v10  ;;  %v1163_v53 = vpop.f32.mrb[78].mxu1  ;;  %v1424_v47 = vpop.f32.mrb[78].mxu0  ;;  %2682 = vmatmul.mubr.msk.f32.gmra.mrb[140].mxu1 %vm1489_vm2, %v3002_v30 }
 0x286   :  { %vm1491_vm4 = vcmp.ge.f32.partialorder %v1424_v47, 0.0  ;;  %v1165_v11 = vpop.f32.mrb[79].mxu1  ;;  %v1426_v23 = vpop.f32.mrb[79].mxu0 }
 0x287   :  { %v2619_v62 = vsel %vm1491_vm4, 1.0, %v3000_v50  ;;  %vm1492_vm5 = vcmp.ge.f32.partialorder %v1426_v23, 0.0  ;;  %2156 = vmatprep.mubr.f32.mxu0 %v1939_v0 }
 0x288   :  { %v1940_v31 = vmul.f32 %v2619_v62, %v1163_v53  ;;  %v2620_v60 = vsel %vm1492_vm5, 1.0, %v3000_v50  ;;  %2683 = vmatprep.mubr.msk.f32.mxu1 %vm1492_vm5, %v3002_v30  ;;  %2157 = vmatmul.mubr.f32.gmra.mrb[140].mxu0 %v1938_v49 }
 0x289   :  { %v1941_v2 = vmul.f32 %v2620_v60, %v1165_v11  ;;  %2684 = vmatmul.mubr.msk.f32.gmra.mrb[142].mxu1 %vm1491_vm4, %v3002_v30 }
 0x28b   :  { %2161 = vmatprep.mubr.f32.mxu0 %v1941_v2 }
 0x28c   :  { %2162 = vmatmul.mubr.f32.gmra.mrb[142].mxu0 %v1940_v31 }
 0x2e0   :  { %v1719_v56 = vpop.f32.mrb[80].mxu1 }
 0x2e1   :  { %2936 = vrcp.f32 %v1719_v56  ;;  %v1721_v42 = vpop.f32.mrb[81].mxu1 }
 0x2e3   :  { %v2008_v36 = vpop.f32.mrb[80].mxu0 }
 0x2e4   :  { %v1724_v63 = vpop.f32.mrb[82].mxu1  ;;  %v2010_v21 = vpop.f32.mrb[81].mxu0  ;;  %v2685_v12 = vadd.f32 -1.0, %v2008_v36 }
 0x2e5   :  { %2938 = vrcp.f32 %v1724_v63  ;;  %v1726_v7 = vpop.f32.mrb[83].mxu1 }
 0x2e7   :  { %v2013_v40 = vpop.f32.mrb[82].mxu0 }
 0x2e8   :  { %v1729_v26 = vpop.f32.mrb[84].mxu1  ;;  %v2015_v45 = vpop.f32.mrb[83].mxu0  ;;  %v2686_v6 = vadd.f32 -1.0, %v2013_v40 }
 0x2e9   :  { %2940 = vrcp.f32 %v1729_v26  ;;  %v1731_v50 = vpop.f32.mrb[85].mxu1 }
 0x2eb   :  { %v2937_v28 = vpop.eup %2936  ;;  %v2018_v38 = vpop.f32.mrb[84].mxu0 }
 0x2ec   :  { %v1734_v44 = vpop.f32.mrb[86].mxu1  ;;  %v2020_v30 = vpop.f32.mrb[85].mxu0  ;;  %v2200_v41 = vmul.f32 %v2937_v28, %v2685_v12  ;;  %v2687_v47 = vadd.f32 -1.0, %v2018_v38 }
 0x2ed   :  { %2942 = vrcp.f32 %v1734_v44  ;;  %v1736_v52 = vpop.f32.mrb[87].mxu1 }
 0x2ee   :  { %v2263_v10 = vsel %vm387_vm1, %v2200_v41, -inf }
 0x2ef   :  { %v2939_v17 = vpop.eup %2938  ;;  %v2023_v16 = vpop.f32.mrb[86].mxu0  ;;  %2264 = vmax.xlane.f32.xlu0 %v2263_v10 }
 0x2f0   :  { %v1739_v49 = vpop.f32.mrb[88].mxu1  ;;  %v2025_v57 = vpop.f32.mrb[87].mxu0  ;;  %v2202_v0 = vmul.f32 %v2939_v17, %v2686_v6  ;;  %v2688_v42 = vadd.f32 -1.0, %v2023_v16 }
 0x2f1   :  { %2944 = vrcp.f32 %v1739_v49  ;;  %v1741_v53 = vpop.f32.mrb[89].mxu1 }
 0x2f2   :  { %v2266_v11 = vsel %vm387_vm1, %v2202_v0, -inf }
 0x2f3   :  { %v2941_v23 = vpop.eup %2940  ;;  %v2028_v62 = vpop.f32.mrb[88].mxu0  ;;  %2267 = vmax.xlane.f32.xlu0 %v2266_v11 }
 0x2f4   :  { %v1744_v31 = vpop.f32.mrb[90].mxu1  ;;  %v2030_v60 = vpop.f32.mrb[89].mxu0  ;;  %v2204_v2 = vmul.f32 %v2941_v23, %v2687_v47  ;;  %v2689_v50 = vadd.f32 -1.0, %v2028_v62 }
 0x2f5   :  { %2946 = vrcp.f32 %v1744_v31  ;;  %v1746_v56 = vpop.f32.mrb[91].mxu1 }
 0x2f6   :  { %v2269_v36 = vsel %vm387_vm1, %v2204_v2, -inf }
 0x2f7   :  { %v2943_v63 = vpop.eup %2942  ;;  %v2033_v21 = vpop.f32.mrb[90].mxu0  ;;  %2270 = vmax.xlane.f32.xlu1 %v2269_v36 }
 0x2f8   :  { %v1749_v7 = vpop.f32.mrb[92].mxu1  ;;  %v2035_v40 = vpop.f32.mrb[91].mxu0  ;;  %v2206_v26 = vmul.f32 %v2943_v63, %v2688_v42  ;;  %v2690_v6 = vadd.f32 -1.0, %v2033_v21 }
 0x2f9   :  { %2948 = vrcp.f32 %v1749_v7  ;;  %v1751_v45 = vpop.f32.mrb[93].mxu1 }
 0x2fa   :  { %v2272_v12 = vsel %vm387_vm1, %v2206_v26, -inf }
 0x2fb   :  { %v2945_v28 = vpop.eup %2944  ;;  %v2038_v38 = vpop.f32.mrb[92].mxu0  ;;  %2273 = vmax.xlane.f32.xlu1 %v2272_v12 }
 0x2fc   :  { %v1754_v44 = vpop.f32.mrb[94].mxu1  ;;  %v2040_v30 = vpop.f32.mrb[93].mxu0  ;;  %v2208_v41 = vmul.f32 %v2945_v28, %v2689_v50  ;;  %v2691_v47 = vadd.f32 -1.0, %v2038_v38 }
 0x2fd   :  { %2950 = vrcp.f32 %v1754_v44  ;;  %v1756_v52 = vpop.f32.mrb[95].mxu1 }
 0x2fe   :  { %v2275_v10 = vsel %vm387_vm1, %v2208_v41, -inf }
 0x2ff   :  { %v2947_v17 = vpop.eup %2946  ;;  %v2043_v16 = vpop.f32.mrb[94].mxu0  ;;  %2276 = vmax.xlane.f32.xlu0 %v2275_v10 }
 0x300   :  { %v1759_v49 = vpop.f32.mrb[96].mxu1  ;;  %v2045_v57 = vpop.f32.mrb[95].mxu0  ;;  %v2210_v0 = vmul.f32 %v2947_v17, %v2690_v6  ;;  %v2692_v42 = vadd.f32 -1.0, %v2043_v16 }
 0x301   :  { %2952 = vrcp.f32 %v1759_v49  ;;  %v1761_v53 = vpop.f32.mrb[97].mxu1 }
 0x302   :  { %v2278_v11 = vsel %vm387_vm1, %v2210_v0, -inf }
 0x303   :  { %v2949_v23 = vpop.eup %2948  ;;  %v2048_v62 = vpop.f32.mrb[96].mxu0  ;;  %2279 = vmax.xlane.f32.xlu1 %v2278_v11 }
 0x304   :  { %v1764_v31 = vpop.f32.mrb[98].mxu1  ;;  %v2050_v60 = vpop.f32.mrb[97].mxu0  ;;  %v2212_v2 = vmul.f32 %v2949_v23, %v2691_v47  ;;  %v2693_v50 = vadd.f32 -1.0, %v2048_v62 }
 0x305   :  { %2954 = vrcp.f32 %v1764_v31  ;;  %v1766_v56 = vpop.f32.mrb[99].mxu1 }
 0x306   :  { %v2281_v36 = vsel %vm387_vm1, %v2212_v2, -inf }
 0x307   :  { %v2951_v63 = vpop.eup %2950  ;;  %v2053_v21 = vpop.f32.mrb[98].mxu0  ;;  %2282 = vmax.xlane.f32.xlu0 %v2281_v36 }
 0x308   :  { %v1769_v7 = vpop.f32.mrb[100].mxu1  ;;  %v2055_v40 = vpop.f32.mrb[99].mxu0  ;;  %v2214_v26 = vmul.f32 %v2951_v63, %v2692_v42  ;;  %v2694_v6 = vadd.f32 -1.0, %v2053_v21 }
 0x309   :  { %2956 = vrcp.f32 %v1769_v7  ;;  %v1771_v45 = vpop.f32.mrb[101].mxu1 }
 0x30a   :  { %v2284_v12 = vsel %vm387_vm1, %v2214_v26, -inf }
 0x30b   :  { %v2953_v28 = vpop.eup %2952  ;;  %v2058_v38 = vpop.f32.mrb[100].mxu0  ;;  %2285 = vmax.xlane.f32.xlu1 %v2284_v12 }
 0x30c   :  { %v1774_v44 = vpop.f32.mrb[102].mxu1  ;;  %v2060_v30 = vpop.f32.mrb[101].mxu0  ;;  %v2216_v41 = vmul.f32 %v2953_v28, %v2693_v50  ;;  %v2695_v47 = vadd.f32 -1.0, %v2058_v38 }
 0x30d   :  { %2958 = vrcp.f32 %v1774_v44  ;;  %v1776_v52 = vpop.f32.mrb[103].mxu1 }
 0x30e   :  { %v2287_v10 = vsel %vm387_vm1, %v2216_v41, -inf }
 0x30f   :  { %v2955_v17 = vpop.eup %2954  ;;  %v2063_v16 = vpop.f32.mrb[102].mxu0  ;;  %2288 = vmax.xlane.f32.xlu0 %v2287_v10 }
 0x310   :  { %v1779_v49 = vpop.f32.mrb[104].mxu1  ;;  %v2065_v57 = vpop.f32.mrb[103].mxu0  ;;  %v2218_v0 = vmul.f32 %v2955_v17, %v2694_v6  ;;  %v2696_v42 = vadd.f32 -1.0, %v2063_v16 }
 0x311   :  { %2960 = vrcp.f32 %v1779_v49  ;;  %v1781_v53 = vpop.f32.mrb[105].mxu1 }
 0x312   :  { %v2290_v11 = vsel %vm387_vm1, %v2218_v0, -inf }
 0x313   :  { %v2957_v23 = vpop.eup %2956  ;;  %v2068_v62 = vpop.f32.mrb[104].mxu0  ;;  %2291 = vmax.xlane.f32.xlu1 %v2290_v11 }
 0x314   :  { %v1784_v31 = vpop.f32.mrb[106].mxu1  ;;  %v2070_v60 = vpop.f32.mrb[105].mxu0  ;;  %v2220_v2 = vmul.f32 %v2957_v23, %v2695_v47  ;;  %v2697_v50 = vadd.f32 -1.0, %v2068_v62 }
 0x315   :  { %2962 = vrcp.f32 %v1784_v31  ;;  %v1786_v56 = vpop.f32.mrb[107].mxu1 }
 0x316   :  { %v2293_v36 = vsel %vm387_vm1, %v2220_v2, -inf }
 0x317   :  { %v2959_v63 = vpop.eup %2958  ;;  %v2073_v21 = vpop.f32.mrb[106].mxu0  ;;  %2294 = vmax.xlane.f32.xlu0 %v2293_v36 }
 0x318   :  { %v1789_v7 = vpop.f32.mrb[108].mxu1  ;;  %v2075_v40 = vpop.f32.mrb[107].mxu0  ;;  %v2222_v26 = vmul.f32 %v2959_v63, %v2696_v42  ;;  %v2698_v6 = vadd.f32 -1.0, %v2073_v21 }
 0x319   :  { %2964 = vrcp.f32 %v1789_v7  ;;  %v1791_v45 = vpop.f32.mrb[109].mxu1 }
 0x31a   :  { %v2296_v12 = vsel %vm387_vm1, %v2222_v26, -inf }
 0x31b   :  { %v2961_v28 = vpop.eup %2960  ;;  %v2078_v38 = vpop.f32.mrb[108].mxu0  ;;  %2297 = vmax.xlane.f32.xlu1 %v2296_v12 }
 0x31c   :  { %v1794_v44 = vpop.f32.mrb[110].mxu1  ;;  %v2080_v30 = vpop.f32.mrb[109].mxu0  ;;  %v2224_v41 = vmul.f32 %v2961_v28, %v2697_v50  ;;  %v2699_v47 = vadd.f32 -1.0, %v2078_v38 }
 0x31d   :  { %2966 = vrcp.f32 %v1794_v44  ;;  %v1796_v52 = vpop.f32.mrb[111].mxu1 }
 0x31e   :  { %v2299_v10 = vsel %vm387_vm1, %v2224_v41, -inf }
 0x31f   :  { %v2963_v17 = vpop.eup %2962  ;;  %v2083_v16 = vpop.f32.mrb[110].mxu0  ;;  %2300 = vmax.xlane.f32.xlu0 %v2299_v10 }
 0x320   :  { %v1799_v49 = vpop.f32.mrb[112].mxu1  ;;  %v2085_v57 = vpop.f32.mrb[111].mxu0  ;;  %v2226_v0 = vmul.f32 %v2963_v17, %v2698_v6  ;;  %v2700_v42 = vadd.f32 -1.0, %v2083_v16 }
 0x321   :  { %2968 = vrcp.f32 %v1799_v49  ;;  %v1801_v53 = vpop.f32.mrb[113].mxu1 }
 0x322   :  { %v2302_v11 = vsel %vm387_vm1, %v2226_v0, -inf }
 0x323   :  { %v2965_v23 = vpop.eup %2964  ;;  %v2088_v62 = vpop.f32.mrb[112].mxu0  ;;  %2303 = vmax.xlane.f32.xlu1 %v2302_v11 }
 0x324   :  { %v1804_v31 = vpop.f32.mrb[114].mxu1  ;;  %v2090_v60 = vpop.f32.mrb[113].mxu0  ;;  %v2228_v2 = vmul.f32 %v2965_v23, %v2699_v47  ;;  %v2701_v50 = vadd.f32 -1.0, %v2088_v62 }
 0x325   :  { %2970 = vrcp.f32 %v1804_v31  ;;  %v1806_v56 = vpop.f32.mrb[115].mxu1 }
 0x326   :  { %v2305_v36 = vsel %vm387_vm1, %v2228_v2, -inf }
 0x327   :  { %v2967_v63 = vpop.eup %2966  ;;  %v2093_v21 = vpop.f32.mrb[114].mxu0  ;;  %2306 = vmax.xlane.f32.xlu0 %v2305_v36 }
 0x328   :  { %v1809_v7 = vpop.f32.mrb[116].mxu1  ;;  %v2095_v40 = vpop.f32.mrb[115].mxu0  ;;  %v2230_v26 = vmul.f32 %v2967_v63, %v2700_v42  ;;  %v2702_v6 = vadd.f32 -1.0, %v2093_v21 }
 0x329   :  { %2972 = vrcp.f32 %v1809_v7  ;;  %v1811_v45 = vpop.f32.mrb[117].mxu1 }
 0x32a   :  { %v2308_v12 = vsel %vm387_vm1, %v2230_v26, -inf }
 0x32b   :  { %v2969_v28 = vpop.eup %2968  ;;  %v2098_v38 = vpop.f32.mrb[116].mxu0  ;;  %2309 = vmax.xlane.f32.xlu1 %v2308_v12 }
 0x32c   :  { %v1814_v44 = vpop.f32.mrb[118].mxu1  ;;  %v2100_v30 = vpop.f32.mrb[117].mxu0  ;;  %v2232_v41 = vmul.f32 %v2969_v28, %v2701_v50  ;;  %v2703_v47 = vadd.f32 -1.0, %v2098_v38 }
 0x32d   :  { %2974 = vrcp.f32 %v1814_v44  ;;  %v1816_v52 = vpop.f32.mrb[119].mxu1 }
 0x32e   :  { %v2311_v10 = vsel %vm387_vm1, %v2232_v41, -inf }
 0x32f   :  { %v2971_v17 = vpop.eup %2970  ;;  %v2103_v16 = vpop.f32.mrb[118].mxu0  ;;  %2312 = vmax.xlane.f32.xlu0 %v2311_v10 }
 0x330   :  { %v1819_v49 = vpop.f32.mrb[120].mxu1  ;;  %v2105_v57 = vpop.f32.mrb[119].mxu0  ;;  %v2234_v0 = vmul.f32 %v2971_v17, %v2702_v6  ;;  %v2704_v42 = vadd.f32 -1.0, %v2103_v16 }
 0x331   :  { %2976 = vrcp.f32 %v1819_v49  ;;  %v1821_v53 = vpop.f32.mrb[121].mxu1 }
 0x332   :  { %v2314_v11 = vsel %vm387_vm1, %v2234_v0, -inf }
 0x333   :  { %v2973_v23 = vpop.eup %2972  ;;  %v2108_v62 = vpop.f32.mrb[120].mxu0  ;;  %2315 = vmax.xlane.f32.xlu1 %v2314_v11 }
 0x334   :  { %v1824_v31 = vpop.f32.mrb[122].mxu1  ;;  %v2110_v60 = vpop.f32.mrb[121].mxu0  ;;  %v2236_v2 = vmul.f32 %v2973_v23, %v2703_v47  ;;  %v2705_v50 = vadd.f32 -1.0, %v2108_v62 }
 0x335   :  { %2978 = vrcp.f32 %v1824_v31  ;;  %v1826_v56 = vpop.f32.mrb[123].mxu1 }
 0x336   :  { %v2317_v36 = vsel %vm387_vm1, %v2236_v2, -inf }
 0x337   :  { %v2975_v63 = vpop.eup %2974  ;;  %v2113_v21 = vpop.f32.mrb[122].mxu0  ;;  %2318 = vmax.xlane.f32.xlu0 %v2317_v36 }
 0x338   :  { %v1829_v7 = vpop.f32.mrb[124].mxu1  ;;  %v2115_v40 = vpop.f32.mrb[123].mxu0  ;;  %v2238_v26 = vmul.f32 %v2975_v63, %v2704_v42  ;;  %v2706_v6 = vadd.f32 -1.0, %v2113_v21 }
 0x339   :  { %2980 = vrcp.f32 %v1829_v7  ;;  %v1831_v45 = vpop.f32.mrb[125].mxu1 }
 0x33a   :  { %v2320_v12 = vsel %vm387_vm1, %v2238_v26, -inf }
 0x33b   :  { %v2977_v28 = vpop.eup %2976  ;;  %v2118_v38 = vpop.f32.mrb[124].mxu0  ;;  %2321 = vmax.xlane.f32.xlu1 %v2320_v12 }
 0x33c   :  { %v1834_v44 = vpop.f32.mrb[126].mxu1  ;;  %v2120_v30 = vpop.f32.mrb[125].mxu0  ;;  %v2240_v41 = vmul.f32 %v2977_v28, %v2705_v50  ;;  %v2707_v47 = vadd.f32 -1.0, %v2118_v38 }
 0x33d   :  { %2982 = vrcp.f32 %v1834_v44  ;;  %v1836_v52 = vpop.f32.mrb[127].mxu1 }
 0x33e   :  { %v2323_v10 = vsel %vm387_vm1, %v2240_v41, -inf }
 0x33f   :  { %v2979_v17 = vpop.eup %2978  ;;  %v2123_v16 = vpop.f32.mrb[126].mxu0  ;;  %2324 = vmax.xlane.f32.xlu0 %v2323_v10 }
 0x340   :  { %v1839_v49 = vpop.f32.mrb[128].mxu1  ;;  %v2125_v57 = vpop.f32.mrb[127].mxu0  ;;  %v2242_v0 = vmul.f32 %v2979_v17, %v2706_v6  ;;  %v2708_v42 = vadd.f32 -1.0, %v2123_v16 }
 0x341   :  { %2984 = vrcp.f32 %v1839_v49  ;;  %v1841_v53 = vpop.f32.mrb[129].mxu1 }
 0x342   :  { %v2326_v11 = vsel %vm387_vm1, %v2242_v0, -inf }
 0x343   :  { %v2981_v23 = vpop.eup %2980  ;;  %v2128_v62 = vpop.f32.mrb[128].mxu0  ;;  %2327 = vmax.xlane.f32.xlu1 %v2326_v11 }
 0x344   :  { %v1844_v31 = vpop.f32.mrb[130].mxu1  ;;  %v2130_v60 = vpop.f32.mrb[129].mxu0  ;;  %v2244_v2 = vmul.f32 %v2981_v23, %v2707_v47  ;;  %v2709_v50 = vadd.f32 -1.0, %v2128_v62 }
 0x345   :  { %2986 = vrcp.f32 %v1844_v31  ;;  %v1846_v56 = vpop.f32.mrb[131].mxu1 }
 0x346   :  { %v2329_v36 = vsel %vm387_vm1, %v2244_v2, -inf }
 0x347   :  { %v2983_v63 = vpop.eup %2982  ;;  %v2133_v21 = vpop.f32.mrb[130].mxu0  ;;  %2330 = vmax.xlane.f32.xlu0 %v2329_v36 }
 0x348   :  { %v1849_v7 = vpop.f32.mrb[132].mxu1  ;;  %v2135_v40 = vpop.f32.mrb[131].mxu0  ;;  %v2246_v26 = vmul.f32 %v2983_v63, %v2708_v42  ;;  %v2710_v6 = vadd.f32 -1.0, %v2133_v21 }
 0x349   :  { %2988 = vrcp.f32 %v1849_v7  ;;  %v1851_v45 = vpop.f32.mrb[133].mxu1 }
 0x34a   :  { %v2332_v12 = vsel %vm387_vm1, %v2246_v26, -inf }
 0x34b   :  { %v2985_v28 = vpop.eup %2984  ;;  %v2138_v38 = vpop.f32.mrb[132].mxu0  ;;  %2333 = vmax.xlane.f32.xlu1 %v2332_v12 }
 0x34c   :  { %v1854_v44 = vpop.f32.mrb[134].mxu1  ;;  %v2140_v30 = vpop.f32.mrb[133].mxu0  ;;  %v2248_v41 = vmul.f32 %v2985_v28, %v2709_v50  ;;  %v2711_v47 = vadd.f32 -1.0, %v2138_v38 }
 0x34d   :  { %2990 = vrcp.f32 %v1854_v44  ;;  %v1856_v52 = vpop.f32.mrb[135].mxu1 }
 0x34e   :  { %v2335_v10 = vsel %vm387_vm1, %v2248_v41, -inf }
 0x34f   :  { %v2987_v17 = vpop.eup %2986  ;;  %v2143_v16 = vpop.f32.mrb[134].mxu0  ;;  %2336 = vmax.xlane.f32.xlu0 %v2335_v10 }
 0x350   :  { %v1859_v49 = vpop.f32.mrb[136].mxu1  ;;  %v2145_v57 = vpop.f32.mrb[135].mxu0  ;;  %v2250_v0 = vmul.f32 %v2987_v17, %v2710_v6  ;;  %v2712_v42 = vadd.f32 -1.0, %v2143_v16 }
 0x351   :  { %2992 = vrcp.f32 %v1859_v49  ;;  %v1861_v53 = vpop.f32.mrb[137].mxu1 }
 0x352   :  { %v2338_v11 = vsel %vm387_vm1, %v2250_v0, -inf }
 0x353   :  { %v2989_v23 = vpop.eup %2988  ;;  %v2148_v62 = vpop.f32.mrb[136].mxu0  ;;  %2339 = vmax.xlane.f32.xlu1 %v2338_v11 }
 0x354   :  { %v1864_v31 = vpop.f32.mrb[138].mxu1  ;;  %v2150_v60 = vpop.f32.mrb[137].mxu0  ;;  %v2252_v2 = vmul.f32 %v2989_v23, %v2711_v47  ;;  %v2713_v50 = vadd.f32 -1.0, %v2148_v62 }
 0x355   :  { %2994 = vrcp.f32 %v1864_v31  ;;  %v1866_v56 = vpop.f32.mrb[139].mxu1 }
 0x356   :  { %v2341_v36 = vsel %vm387_vm1, %v2252_v2, -inf }
 0x357   :  { %v2991_v63 = vpop.eup %2990  ;;  %v2153_v21 = vpop.f32.mrb[138].mxu0  ;;  %2342 = vmax.xlane.f32.xlu0 %v2341_v36 }
 0x358   :  { %v1869_v7 = vpop.f32.mrb[140].mxu1  ;;  %v2155_v40 = vpop.f32.mrb[139].mxu0  ;;  %v2254_v26 = vmul.f32 %v2991_v63, %v2712_v42  ;;  %v2714_v6 = vadd.f32 -1.0, %v2153_v21 }
 0x359   :  { %2996 = vrcp.f32 %v1869_v7  ;;  %v1871_v45 = vpop.f32.mrb[141].mxu1 }
 0x35a   :  { %v2344_v12 = vsel %vm387_vm1, %v2254_v26, -inf }
 0x35b   :  { %v2993_v28 = vpop.eup %2992  ;;  %v2158_v38 = vpop.f32.mrb[140].mxu0  ;;  %2345 = vmax.xlane.f32.xlu1 %v2344_v12 }
 0x35c   :  { %v1874_v44 = vpop.f32.mrb[142].mxu1  ;;  %v2160_v30 = vpop.f32.mrb[141].mxu0  ;;  %v2256_v41 = vmul.f32 %v2993_v28, %v2713_v50  ;;  %v2715_v0 = vadd.f32 -1.0, %v2158_v38 }
 0x35d   :  { %2998 = vrcp.f32 %v1874_v44  ;;  %v1876_v52 = vpop.f32.mrb[143].mxu1 }
 0x35e   :  { %v2347_v10 = vsel %vm387_vm1, %v2256_v41, -inf }
 0x35f   :  { %v2995_v17 = vpop.eup %2994  ;;  %v2163_v16 = vpop.f32.mrb[142].mxu0  ;;  %2348 = vmax.xlane.f32.xlu0 %v2347_v10 }
 0x360   :  { %v2165_v49 = vpop.f32.mrb[143].mxu0  ;;  %v2258_v57 = vmul.f32 %v2995_v17, %v2714_v6  ;;  %v2716_v23 = vadd.f32 -1.0, %v2163_v16 }
 0x362   :  { %v2350_v53 = vsel %vm387_vm1, %v2258_v57, -inf }
 0x363   :  { %v2997_v47 = vpop.eup %2996  ;;  %2351 = vmax.xlane.f32.xlu1 %v2350_v53 }
 0x364   :  { %v2260_v11 = vmul.f32 %v2997_v47, %v2715_v0 }
 0x366   :  { %v2353_v62 = vsel %vm387_vm1, %v2260_v11, -inf }
 0x367   :  { %v2999_v31 = vpop.eup %2998  ;;  %2354 = vmax.xlane.f32.xlu0 %v2353_v62 }
 0x368   :  { %v2262_v60 = vmul.f32 %v2999_v31, %v2716_v23 }
 0x36a   :  { %v2356_v2 = vsel %vm387_vm1, %v2262_v60, -inf }
 0x36b   :  { %2357 = vmax.xlane.f32.xlu1 %v2356_v2 }
 0x37c   :  { %v2265_v56 = vpop.xlane.xlu0 %2264 }
 0x37d   :  { %v2359_v42 = vsub.f32 %v3599_v61, %v2265_v56 }
 0x37f   :  { %v2391_v36 = vmax.f32 %v2359_v42, 0.0 }
 0x380   :  { %v2268_v63 = vpop.xlane.xlu0 %2267 }
 0x381   :  { %2423 = vst.msk [vmem:[%s4519_s8] sm:$0xff] %vm387_vm1, %v2391_v36  ;;  %v2360_v21 = vsub.f32 %v3625_v59, %v2268_v63 }
 0x383   :  { %v2392_v7 = vmax.f32 %v2360_v21, 0.0 }
 0x384   :  { %v2271_v40 = vpop.xlane.xlu1 %2270 }
 0x385   :  { %2424 = vst.msk [vmem:[%s4519_s8 + $0x8] sm:$0xff] %vm387_vm1, %v2392_v7  ;;  %v2361_v26 = vsub.f32 %v3646_v13, %v2271_v40 }
 0x387   :  { %v2393_v45 = vmax.f32 %v2361_v26, 0.0 }
 0x388   :  { %v2274_v61 = vpop.xlane.xlu1 %2273 }
 0x389   :  { %2425 = vst.msk [vmem:[%s4519_s8 + $0x10] sm:$0xff] %vm387_vm1, %v2393_v45  ;;  %v2362_v50 = vsub.f32 %v3657_v35, %v2274_v61 }
 0x38b   :  { %v2394_v12 = vmax.f32 %v2362_v50, 0.0 }
 0x38c   :  { %v2277_v59 = vpop.xlane.xlu0 %2276 }
 0x38d   :  { %2426 = vst.msk [vmem:[%s4519_s8 + $0x18] sm:$0xff] %vm387_vm1, %v2394_v12  ;;  %v2363_v28 = vsub.f32 %v3732_v4, %v2277_v59 }
 0x38f   :  { %v2395_v38 = vmax.f32 %v2363_v28, 0.0 }
 0x390   :  { %v2280_v13 = vpop.xlane.xlu1 %2279 }
 0x391   :  { %2427 = vst.msk [vmem:[%s4519_s8 + $0x20] sm:$0xff] %vm387_vm1, %v2395_v38  ;;  %v2364_v44 = vsub.f32 %v3772_v20, %v2280_v13 }
 0x393   :  { %v2396_v30 = vmax.f32 %v2364_v44, 0.0 }
 0x394   :  { %v2283_v35 = vpop.xlane.xlu0 %2282 }
 0x395   :  { %2428 = vst.msk [vmem:[%s4519_s8 + $0x28] sm:$0xff] %vm387_vm1, %v2396_v30  ;;  %v2365_v41 = vsub.f32 %v3789_v29, %v2283_v35 }
 0x397   :  { %v2397_v52 = vmax.f32 %v2365_v41, 0.0 }
 0x398   :  { %v2286_v4 = vpop.xlane.xlu1 %2285 }
 0x399   :  { %2429 = vst.msk [vmem:[%s4519_s8 + $0x30] sm:$0xff] %vm387_vm1, %v2397_v52  ;;  %v2366_v6 = vsub.f32 %v3825_v8, %v2286_v4 }
 0x39b   :  { %v2398_v10 = vmax.f32 %v2366_v6, 0.0 }
 0x39c   :  { %v2289_v20 = vpop.xlane.xlu0 %2288 }
 0x39d   :  { %2430 = vst.msk [vmem:[%s4519_s8 + $0x38] sm:$0xff] %vm387_vm1, %v2398_v10  ;;  %v2367_v17 = vsub.f32 %v3870_v18, %v2289_v20 }
 0x39f   :  { %v2399_v16 = vmax.f32 %v2367_v17, 0.0 }
 0x3a0   :  { %v2292_v29 = vpop.xlane.xlu1 %2291 }
 0x3a1   :  { %2431 = vst.msk [vmem:[%s4519_s8 + $0x40] sm:$0xff] %vm387_vm1, %v2399_v16  ;;  %v2368_v49 = vsub.f32 %v3872_v14, %v2292_v29 }
 0x3a3   :  { %v2400_v57 = vmax.f32 %v2368_v49, 0.0 }
 0x3a4   :  { %v2295_v8 = vpop.xlane.xlu0 %2294 }
 0x3a5   :  { %2432 = vst.msk [vmem:[%s4519_s8 + $0x48] sm:$0xff] %vm387_vm1, %v2400_v57  ;;  %v2369_v0 = vsub.f32 %v3888_v54, %v2295_v8 }
 0x3a7   :  { %v2401_v53 = vmax.f32 %v2369_v0, 0.0 }
 0x3a8   :  { %v2298_v18 = vpop.xlane.xlu1 %2297 }
 0x3a9   :  { %2433 = vst.msk [vmem:[%s4519_s8 + $0x50] sm:$0xff] %vm387_vm1, %v2401_v53  ;;  %v2370_v47 = vsub.f32 %v3977_v19, %v2298_v18 }
 0x3ab   :  { %v2402_v11 = vmax.f32 %v2370_v47, 0.0 }
 0x3ac   :  { %v2301_v14 = vpop.xlane.xlu0 %2300 }
 0x3ad   :  { %2434 = vst.msk [vmem:[%s4519_s8 + $0x58] sm:$0xff] %vm387_vm1, %v2402_v11  ;;  %v2371_v23 = vsub.f32 %v4006_v43, %v2301_v14 }
 0x3af   :  { %v2403_v62 = vmax.f32 %v2371_v23, 0.0 }
 0x3b0   :  { %v2304_v54 = vpop.xlane.xlu1 %2303 }
 0x3b1   :  { %2435 = vst.msk [vmem:[%s4519_s8 + $0x60] sm:$0xff] %vm387_vm1, %v2403_v62  ;;  %v2372_v31 = vsub.f32 %v4028_v24, %v2304_v54 }
 0x3b3   :  { %v2404_v60 = vmax.f32 %v2372_v31, 0.0 }
 0x3b4   :  { %v2307_v19 = vpop.xlane.xlu0 %2306 }
 0x3b5   :  { %2436 = vst.msk [vmem:[%s4519_s8 + $0x68] sm:$0xff] %vm387_vm1, %v2404_v60  ;;  %v2373_v2 = vsub.f32 %v4049_v33, %v2307_v19 }
 0x3b7   :  { %v2405_v56 = vmax.f32 %v2373_v2, 0.0 }
 0x3b8   :  { %v2310_v43 = vpop.xlane.xlu1 %2309 }
 0x3b9   :  { %2437 = vst.msk [vmem:[%s4519_s8 + $0x70] sm:$0xff] %vm387_vm1, %v2405_v56  ;;  %v2374_v42 = vsub.f32 %v4069_v1, %v2310_v43 }
 0x3bb   :  { %v2406_v36 = vmax.f32 %v2374_v42, 0.0 }
 0x3bc   :  { %v2313_v24 = vpop.xlane.xlu0 %2312 }
 0x3bd   :  { %2438 = vst.msk [vmem:[%s4519_s8 + $0x78] sm:$0xff] %vm387_vm1, %v2406_v36  ;;  %v2375_v63 = vsub.f32 %v3683_v46, %v2313_v24 }
 0x3bf   :  { %v2407_v21 = vmax.f32 %v2375_v63, 0.0 }
 0x3c0   :  { %v2316_v33 = vpop.xlane.xlu1 %2315 }
 0x3c1   :  { %2439 = vst.msk [vmem:[%s4519_s8 + $0x80] sm:$0xff] %vm387_vm1, %v2407_v21  ;;  %v2376_v7 = vsub.f32 %v3694_v58, %v2316_v33 }
 0x3c3   :  { %v2408_v40 = vmax.f32 %v2376_v7, 0.0 }
 0x3c4   :  { %v2319_v1 = vpop.xlane.xlu0 %2318 }
 0x3c5   :  { %2440 = vst.msk [vmem:[%s4519_s8 + $0x88] sm:$0xff] %vm387_vm1, %v2408_v40  ;;  %v2377_v26 = vsub.f32 %v3696_v3, %v2319_v1 }
 0x3c7   :  { %v2409_v45 = vmax.f32 %v2377_v26, 0.0 }
 0x3c8   :  { %v2322_v46 = vpop.xlane.xlu1 %2321 }
 0x3c9   :  { %2441 = vst.msk [vmem:[%s4519_s8 + $0x90] sm:$0xff] %vm387_vm1, %v2409_v45  ;;  %v2378_v61 = vsub.f32 %v3727_v37, %v2322_v46 }
 0x3cb   :  { %v2410_v50 = vmax.f32 %v2378_v61, 0.0 }
 0x3cc   :  { %v2325_v58 = vpop.xlane.xlu0 %2324 }
 0x3cd   :  { %2442 = vst.msk [vmem:[%s4519_s8 + $0x98] sm:$0xff] %vm387_vm1, %v2410_v50  ;;  %v2379_v12 = vsub.f32 %v3734_v51, %v2325_v58 }
 0x3cf   :  { %v2411_v59 = vmax.f32 %v2379_v12, 0.0 }
 0x3d0   :  { %v2328_v3 = vpop.xlane.xlu1 %2327 }
 0x3d1   :  { %2443 = vst.msk [vmem:[%s4519_s8 + $0xa0] sm:$0xff] %vm387_vm1, %v2411_v59  ;;  %v2380_v28 = vsub.f32 %v3763_v25, %v2328_v3 }
 0x3d3   :  { %v2412_v38 = vmax.f32 %v2380_v28, 0.0 }
 0x3d4   :  { %v2331_v37 = vpop.xlane.xlu0 %2330 }
 0x3d5   :  { %2444 = vst.msk [vmem:[%s4519_s8 + $0xa8] sm:$0xff] %vm387_vm1, %v2412_v38  ;;  %v2381_v13 = vsub.f32 %v3711_v15, %v2331_v37 }
 0x3d7   :  { %v2413_v44 = vmax.f32 %v2381_v13, 0.0 }
 0x3d8   :  { %v2334_v51 = vpop.xlane.xlu1 %2333 }
 0x3d9   :  { %2445 = vst.msk [vmem:[%s4519_s8 + $0xb0] sm:$0xff] %vm387_vm1, %v2413_v44  ;;  %v2382_v30 = vsub.f32 %v3770_v22, %v2334_v51 }
 0x3db   :  { %v2414_v35 = vmax.f32 %v2382_v30, 0.0 }
 0x3dc   :  { %v2337_v25 = vpop.xlane.xlu0 %2336 }
 0x3dd   :  { %2446 = vst.msk [vmem:[%s4519_s8 + $0xb8] sm:$0xff] %vm387_vm1, %v2414_v35  ;;  %v2383_v41 = vsub.f32 %v3934_v48, %v2337_v25 }
 0x3df   :  { %v2415_v52 = vmax.f32 %v2383_v41, 0.0 }
 0x3e0   :  { %v2340_v15 = vpop.xlane.xlu1 %2339 }
 0x3e1   :  { %2447 = vst.msk [vmem:[%s4519_s8 + $0xc0] sm:$0xff] %vm387_vm1, %v2415_v52  ;;  %v2384_v4 = vsub.f32 %v3936_v32, %v2340_v15 }
 0x3e3   :  { %v2416_v6 = vmax.f32 %v2384_v4, 0.0 }
 0x3e4   :  { %v2343_v22 = vpop.xlane.xlu0 %2342 }
 0x3e5   :  { %2448 = vst.msk [vmem:[%s4519_s8 + $0xc8] sm:$0xff] %vm387_vm1, %v2416_v6  ;;  %v2385_v10 = vsub.f32 %v3939_v34, %v2343_v22 }
 0x3e7   :  { %v2417_v20 = vmax.f32 %v2385_v10, 0.0 }
 0x3e8   :  { %v2346_v48 = vpop.xlane.xlu1 %2345 }
 0x3e9   :  { %2449 = vst.msk [vmem:[%s4519_s8 + $0xd0] sm:$0xff] %vm387_vm1, %v2417_v20  ;;  %v2386_v17 = vsub.f32 %v3941_v27, %v2346_v48 }
 0x3eb   :  { %v2418_v16 = vmax.f32 %v2386_v17, 0.0 }
 0x3ec   :  { %v2349_v32 = vpop.xlane.xlu0 %2348 }
 0x3ed   :  { %2450 = vst.msk [vmem:[%s4519_s8 + $0xd8] sm:$0xff] %vm387_vm1, %v2418_v16  ;;  %v2387_v29 = vsub.f32 %v3943_v39, %v2349_v32 }
 0x3ef   :  { %v2419_v49 = vmax.f32 %v2387_v29, 0.0 }
 0x3f0   :  { %v2352_v34 = vpop.xlane.xlu1 %2351 }
 0x3f1   :  { %2451 = vst.msk [vmem:[%s4519_s8 + $0xe0] sm:$0xff] %vm387_vm1, %v2419_v49  ;;  %v2388_v57 = vsub.f32 %v3973_v9, %v2352_v34 }
 0x3f3   :  { %v2420_v8 = vmax.f32 %v2388_v57, 0.0 }
 0x3f4   :  { %v2355_v27 = vpop.xlane.xlu0 %2354 }
 0x3f5   :  { %2452 = vst.msk [vmem:[%s4519_s8 + $0xe8] sm:$0xff] %vm387_vm1, %v2420_v8  ;;  %v2389_v0 = vsub.f32 %v3948_v5, %v2355_v27 }
 0x3f7   :  { %v2421_v53 = vmax.f32 %v2389_v0, 0.0 }
 0x3f8   :  { %v2358_v39 = vpop.xlane.xlu1 %2357 }
 0x3f9   :  { %2453 = vst.msk [vmem:[%s4519_s8 + $0xf0] sm:$0xff] %vm387_vm1, %v2421_v53  ;;  %v2390_v18 = vsub.f32 %v3994_v55, %v2358_v39 }
 0x3fb   :  { %v2422_v47 = vmax.f32 %v2390_v18, 0.0 }
 0x3fd   :  { %2454 = vst.msk [vmem:[%s4519_s8 + $0xf8] sm:$0xff] %vm387_vm1, %v2422_v47 }

</bundles_post_ra>
